<compile_context>
chip_gen: v5e
topology: v5e:2x2
jax: 0.10.0
libtpu: 0.0.40
codegen_flags: <defaults>
</compile_context>

<pallas_src>
import functools

import jax
import jax.numpy as jnp
import numpy as np
from jax import lax
from jax.experimental import pallas as pl
from jax.experimental.pallas import tpu as pltpu


def _round_up(n, m):
    return ((n + m - 1) // m) * m


def _pick_tile(n, candidates):
    for c in candidates:
        if c <= n and n % c == 0:
            return c
    return n


def _vmem_limit_bytes():
    kind = ""
    try:
        kind = jax.devices()[0].device_kind.lower()
    except Exception:
        pass
    if ("v4" in kind) or ("v5" in kind) or ("v6" in kind):
        return 100 * 1024 * 1024     # 128 MiB physical VMEM parts: allow resident KV / big tiles
    return 56 * 1024 * 1024          # v7x (64 MiB physical) & unknown: leave Mosaic headroom


# --------------------- kernel 1: GroupNorm affine + fused QKV -----------------
def gn_qkv_kernel(x_ref, scale_ref, shift_ref, w_ref, b_ref, q_ref, k_ref, v_ref, *, C):
    # x block is (1, C, tn) in the native channel-major layout -> transpose in-kernel
    # (XLU; overlapped with the MXU matmul) instead of paying an XLA transpose pass.
    x_row = jnp.transpose(x_ref[0])                                # (tn, C) f32
    h = (x_row * scale_ref[0] + shift_ref[0]).astype(jnp.bfloat16)  # GroupNorm affine
    qkv = jnp.dot(h, w_ref[...], preferred_element_type=jnp.float32) + b_ref[...]  # (tn, 3C)
    q_ref[0] = qkv[:, :C].astype(jnp.bfloat16)      # q already scaled by C^-0.5 (folded in W/b)
    k_ref[0] = qkv[:, C:2 * C].astype(jnp.bfloat16)
    v_ref[0] = qkv[:, 2 * C:].astype(jnp.bfloat16)


# --------------------- kernel 2: flash attention + out NIN + residual ---------
def flash_attn_kernel(x_ref, q_ref, k_ref, v_ref, w3_ref, b3_ref, o_ref,
                      m_sc, l_sc, acc_sc, *, tk, kv_block, n_real, needs_mask, skip_rescale):
    ki = pl.program_id(2)

    @pl.when(ki == 0)
    def _init():
        m_sc[...] = jnp.full(m_sc.shape, -1e30, jnp.float32)
        l_sc[...] = jnp.zeros(l_sc.shape, jnp.float32)
        acc_sc[...] = jnp.zeros(acc_sc.shape, jnp.float32)

    q = q_ref[0]                                  # (tq, C) bf16, pre-scaled
    n_steps = kv_block // tk
    kv_base = ki * kv_block

    def kv_step(s):
        if isinstance(s, int):
            off = s * tk
        else:
            off = pl.multiple_of(s * tk, tk)
        k = k_ref[0, pl.ds(off, tk), :]           # (tk, C) bf16
        v = v_ref[0, pl.ds(off, tk), :]
        # Contract channel axes directly (A·B^T form; no explicit transpose).
        s_mat = lax.dot_general(q, k, (((1,), (1,)), ((), ())),
                                preferred_element_type=jnp.float32)   # (tq, tk)
        if needs_mask:
            kv_pos = kv_base + off + lax.broadcasted_iota(jnp.int32, (1, tk), 1)
            valid = kv_pos < n_real
            s_mat = jnp.where(valid, s_mat, -1e30)
        m_prev = m_sc[...]
        m_new = jnp.maximum(m_prev, jnp.max(s_mat, axis=-1, keepdims=True))
        alpha = jnp.exp(m_prev - m_new)
        p = jnp.exp(s_mat - m_new)
        if needs_mask:
            p = jnp.where(valid, p, 0.0)
        l_sc[...] = alpha * l_sc[...] + jnp.sum(p, axis=-1, keepdims=True)
        acc_sc[...] = alpha * acc_sc[...] + jnp.dot(
            p.astype(jnp.bfloat16), v, preferred_element_type=jnp.float32)
        m_sc[...] = m_new

    if n_steps == 1:
        kv_step(0)
    else:
        def body(s, carry):
            kv_step(s)
            return carry
        lax.fori_loop(0, n_steps, body, 0)

    @pl.when(ki == pl.num_programs(2) - 1)
    def _finalize():
        # Exact reciprocal: runs once per q tile, negligible cost, no approx error.
        attn = acc_sc[...] * pl.reciprocal(l_sc[...], approx=False)
        hout = jnp.dot(attn.astype(jnp.bfloat16), w3_ref[...],
                       preferred_element_type=jnp.float32) + b3_ref[...]   # (tq, C) f32
        y_ct = x_ref[0] + jnp.transpose(hout)     # residual in channel-major layout
        if skip_rescale:
            y_ct = y_ct * (2.0 ** -0.5)
        o_ref[0] = y_ct


# --------------------------------- wrapper ------------------------------------
@functools.partial(jax.jit, static_argnames=("skip_rescale", "eps"))
def attn_blockpp(x_nchw, params, *, skip_rescale=False, eps=1e-6):
    """x_nchw: (B, C, H, W) float32 (PyTorch layout)."""
    B, C, H, W = x_nchw.shape
    N = H * W
    G = min(C // 4, 32)
    cg = C // G
    scale = float(C) ** (-0.5)
    vmem_limit = _vmem_limit_bytes()

    x32 = x_nchw.astype(jnp.float32)

    # ---- GroupNorm statistics pre-pass (two-pass variance; cheap XLA reduce) ----
    xg = x32.reshape(B, G, cg * H * W)
    mean_g = jnp.mean(xg, axis=-1)                                   # (B, G)
    var_g = jnp.mean(jnp.square(xg - mean_g[..., None]), axis=-1)    # biased, like torch
    inv_g = lax.rsqrt(var_g + eps)
    inv_c = jnp.repeat(inv_g, cg, axis=1)                            # (B, C)
    mean_c = jnp.repeat(mean_g, cg, axis=1)
    gamma = params["gamma"].astype(jnp.float32)
    beta = params["beta"].astype(jnp.float32)
    scale_c = (inv_c * gamma[None, :]).reshape(B, 1, C)
    shift_c = (beta[None, :] - mean_c * inv_c * gamma[None, :]).reshape(B, 1, C)

    # ---- flatten spatial, pad to a lane-aligned multiple of 128 ----
    N_pad = _round_up(N, 128)
    x_flat = x32.reshape(B, C, N)
    x_pad = x_flat if N_pad == N else jnp.pad(x_flat, ((0, 0), (0, 0), (0, N_pad - N)))

    # ---- fused QKV weights (C, 3C); q scale folded into Wq / bq ----
    w_qkv = jnp.concatenate(
        [params["wq"].astype(jnp.float32) * scale,
         params["wk"].astype(jnp.float32),
         params["wv"].astype(jnp.float32)], axis=1).astype(jnp.bfloat16)
    b_qkv = jnp.concatenate(
        [params["bq"].astype(jnp.float32) * scale,
         params["bk"].astype(jnp.float32),
         params["bv"].astype(jnp.float32)]).reshape(1, 3 * C)
    w3_b = params["w3"].astype(jnp.bfloat16)
    b3 = params["b3"].reshape(1, C).astype(jnp.float32)

    # ---- kernel 1: normalize + fused QKV, tiled over (B, N_pad) ----
    tn = _pick_tile(N_pad, (512, 256, 128))
    q_r, k_r, v_r = pl.pallas_call(
        functools.partial(gn_qkv_kernel, C=C),
        out_shape=tuple(jax.ShapeDtypeStruct((B, N_pad, C), jnp.bfloat16) for _ in range(3)),
        grid=(B, N_pad // tn),
        in_specs=[
            pl.BlockSpec((1, C, tn), lambda b, i: (b, 0, i)),       # x (channel-major)
            pl.BlockSpec((1, 1, C), lambda b, i: (b, 0, 0)),        # GN scale
            pl.BlockSpec((1, 1, C), lambda b, i: (b, 0, 0)),        # GN shift
            pl.BlockSpec((C, 3 * C), lambda b, i: (0, 0)),          # W_qkv (bf16)
            pl.BlockSpec((1, 3 * C), lambda b, i: (0, 0)),          # b_qkv
        ],
        out_specs=tuple(pl.BlockSpec((1, tn, C), lambda b, i: (b, i, 0)) for _ in range(3)),
        compiler_params=pltpu.CompilerParams(
            dimension_semantics=("parallel", "parallel"),
            vmem_limit_bytes=vmem_limit),
    )(x_pad, scale_c, shift_c, w_qkv, b_qkv)

    # ---- kernel 2: flash attention + output NIN + residual ----
    kv_bytes = 2 * N_pad * C * 2                        # K + V (bf16), one copy
    resident = (2 * kv_bytes) <= (vmem_limit // 2)      # x2: Pallas double-buffers blocks
    if resident:
        kv_block = N_pad                                # fetched once per batch
        tq = _pick_tile(N_pad, (256, 128))
    else:
        # Very long sequences (v7x-style fallback): bigger q tiles, stream K/V per tile.
        tq = _pick_tile(N_pad, (1024, 512, 256, 128))
        kv_block = tq
    tk = _pick_tile(kv_block, (512, 256, 128))
    nq, nkv = N_pad // tq, N_pad // kv_block

    out_pad = pl.pallas_call(
        functools.partial(flash_attn_kernel, tk=tk, kv_block=kv_block, n_real=N,
                          needs_mask=(N_pad != N), skip_rescale=skip_rescale),
        out_shape=jax.ShapeDtypeStruct((B, C, N_pad), jnp.float32),
        grid=(B, nq, nkv),
        in_specs=[
            pl.BlockSpec((1, C, tq), lambda b, qi, ki: (b, 0, qi)),        # x (residual)
            pl.BlockSpec((1, tq, C), lambda b, qi, ki: (b, qi, 0)),        # q (bf16, scaled)
            pl.BlockSpec((1, kv_block, C), lambda b, qi, ki: (b, ki, 0)),  # k
            pl.BlockSpec((1, kv_block, C), lambda b, qi, ki: (b, ki, 0)),  # v
            pl.BlockSpec((C, C), lambda b, qi, ki: (0, 0)),                # W3 (bf16)
            pl.BlockSpec((1, C), lambda b, qi, ki: (0, 0)),                # b3
        ],
        out_specs=pl.BlockSpec((1, C, tq), lambda b, qi, ki: (b, 0, qi)),
        scratch_shapes=[pltpu.VMEM((tq, 1), jnp.float32),    # m (running max)
                        pltpu.VMEM((tq, 1), jnp.float32),    # l (running denom)
                        pltpu.VMEM((tq, C), jnp.float32)],   # acc
        input_output_aliases={0: 0},   # residual written back into x's (padded) buffer
        compiler_params=pltpu.CompilerParams(
            dimension_semantics=("parallel", "parallel", "arbitrary"),
            vmem_limit_bytes=vmem_limit),
    )(x_pad, q_r, k_r, v_r, w3_b, b3)

    out = out_pad if N_pad == N else out_pad[:, :, :N]
    return out.reshape(B, C, H, W)


# --------------------------- pure-JAX reference --------------------------------
def attn_blockpp_reference(x, params, *, skip_rescale=False, eps=1e-6):
    B, C, H, W = x.shape
    G = min(C // 4, 32)
    cg = C // G
    xr = x.reshape(B, G, cg, H, W)
    mean = xr.mean(axis=(2, 3, 4), keepdims=True)
    var = xr.var(axis=(2, 3, 4), keepdims=True)
    h = ((xr - mean) / jnp.sqrt(var + eps)).reshape(B, C, H, W)
    h = h * params["gamma"][None, :, None, None] + params["beta"][None, :, None, None]

    def nin(t, Wm, bm):
        tp = jnp.transpose(t, (0, 2, 3, 1))
        y = jnp.einsum("bhwc,cd->bhwd", tp, Wm) + bm
        return jnp.transpose(y, (0, 3, 1, 2))

    q = nin(h, params["wq"], params["bq"])
    k = nin(h, params["wk"], params["bk"])
    v = nin(h, params["wv"], params["bv"])
    w = jnp.einsum("bchw,bcij->bhwij", q, k) * (int(C) ** (-0.5))
    w = w.reshape(B, H, W, H * W)
    w = jax.nn.softmax(w, axis=-1)
    w = w.reshape(B, H, W, H, W)
    hh = jnp.einsum("bhwij,bcij->bchw", w, v)
    hh = nin(hh, params["w3"], params["b3"])
    out = x + hh
    if skip_rescale:
        out = out / jnp.sqrt(2.0)
    return out


if __name__ == "__main__":
    def make_params(key, C):
        ks = jax.random.split(key, 10)
        return {
            "gamma": 1.0 + 0.1 * jax.random.normal(ks[0], (C,), jnp.float32),
            "beta": 0.1 * jax.random.normal(ks[1], (C,), jnp.float32),
            "wq": 0.1 * jax.random.normal(ks[2], (C, C), jnp.float32),
            "bq": 0.05 * jax.random.normal(ks[3], (C,), jnp.float32),
            "wk": 0.1 * jax.random.normal(ks[4], (C, C), jnp.float32),
            "bk": 0.05 * jax.random.normal(ks[5], (C,), jnp.float32),
            "wv": 0.1 * jax.random.normal(ks[6], (C, C), jnp.float32),
            "bv": 0.05 * jax.random.normal(ks[7], (C,), jnp.float32),
            "w3": 0.1 * jax.random.normal(ks[8], (C, C), jnp.float32),
            "b3": 0.05 * jax.random.normal(ks[9], (C,), jnp.float32),
        }

    key = jax.random.PRNGKey(0)
    kp, kx1, kx2 = jax.random.split(key, 3)

    # Case 1: lane-friendly spatial size (no padding path).
    B, C, H, W = 2, 8, 8, 8
    params = make_params(kp, C)
    x = jax.random.normal(kx1, (B, C, H, W), jnp.float32)
    y = jax.block_until_ready(attn_blockpp(x, params, skip_rescale=False))
    y_ref = attn_blockpp_reference(x, params, skip_rescale=False)
    assert y.shape == (B, C, H, W)
    # bf16 MXU inputs -> loosen tolerance vs the f32 reference.
    np.testing.assert_allclose(np.asarray(y), np.asarray(y_ref), rtol=2e-2, atol=2e-2)

    # Case 2: non-aligned spatial size (exercises padding + kv masking) + skip_rescale.
    B2, C2, H2, W2 = 1, 8, 6, 6
    x2 = jax.random.normal(kx2, (B2, C2, H2, W2), jnp.float32)
    y2 = jax.block_until_ready(attn_blockpp(x2, params, skip_rescale=True))
    y2_ref = attn_blockpp_reference(x2, params, skip_rescale=True)
    np.testing.assert_allclose(np.asarray(y2), np.asarray(y2_ref), rtol=2e-2, atol=2e-2)

    print("KERNEL_OK")
</pallas_src>

<mosaic_0001>
module attributes {stable_mosaic.version = 11 : i64} {
  func.func @gn_qkv_kernel(%arg0: i32, %arg1: i32, %arg2: memref<1x8x128xf32, #tpu.memory_space<vmem>>, %arg3: memref<1x1x8xf32, #tpu.memory_space<vmem>>, %arg4: memref<1x1x8xf32, #tpu.memory_space<vmem>>, %arg5: memref<8x24xbf16, #tpu.memory_space<vmem>>, %arg6: memref<1x24xf32, #tpu.memory_space<vmem>>, %arg7: memref<1x128x8xbf16, #tpu.memory_space<vmem>>, %arg8: memref<1x128x8xbf16, #tpu.memory_space<vmem>>, %arg9: memref<1x128x8xbf16, #tpu.memory_space<vmem>>) attributes {dimension_semantics = [#tpu.dimension_semantics<parallel>, #tpu.dimension_semantics<parallel>], iteration_bounds = array<i64: 2, 1>, scalar_prefetch = 0 : i64, scratch_operands = 0 : i64, tpu.core_type = #tpu.core_type<tc>, window_params = [{transform_indices = @transform_0, window_bounds = array<i64: 1, 8, 128>}, {transform_indices = @transform_1, window_bounds = array<i64: 1, 1, 8>}, {transform_indices = @transform_2, window_bounds = array<i64: 1, 1, 8>}, {pipeline_mode = #tpu.pipeline_mode<synchronous>, transform_indices = @transform_3, window_bounds = array<i64: 8, 24>}, {pipeline_mode = #tpu.pipeline_mode<synchronous>, transform_indices = @transform_4, window_bounds = array<i64: 1, 24>}, {transform_indices = @transform_5, window_bounds = array<i64: 1, 128, 8>}, {transform_indices = @transform_6, window_bounds = array<i64: 1, 128, 8>}, {transform_indices = @transform_7, window_bounds = array<i64: 1, 128, 8>}]} {
    %c0 = arith.constant 0 : index
    %c0_0 = arith.constant 0 : index
    %c0_1 = arith.constant 0 : index
    %0 = vector.load %arg2[%c0, %c0_0, %c0_1] : memref<1x8x128xf32, #tpu.memory_space<vmem>>, vector<1x8x128xf32>
    %1 = vector.shape_cast %0 : vector<1x8x128xf32> to vector<8x128xf32>
    %2 = tpu.transpose %1, [1, 0] : vector<8x128xf32> -> vector<128x8xf32>
    %c0_2 = arith.constant 0 : index
    %c0_3 = arith.constant 0 : index
    %c0_4 = arith.constant 0 : index
    %3 = vector.load %arg3[%c0_2, %c0_3, %c0_4] : memref<1x1x8xf32, #tpu.memory_space<vmem>>, vector<1x1x8xf32>
    %4 = vector.shape_cast %3 : vector<1x1x8xf32> to vector<1x8xf32>
    %5 = vector.broadcast %4 : vector<1x8xf32> to vector<128x8xf32>
    %6 = arith.mulf %2, %5 : vector<128x8xf32>
    %c0_5 = arith.constant 0 : index
    %c0_6 = arith.constant 0 : index
    %c0_7 = arith.constant 0 : index
    %7 = vector.load %arg4[%c0_5, %c0_6, %c0_7] : memref<1x1x8xf32, #tpu.memory_space<vmem>>, vector<1x1x8xf32>
    %8 = vector.shape_cast %7 : vector<1x1x8xf32> to vector<1x8xf32>
    %9 = vector.broadcast %8 : vector<1x8xf32> to vector<128x8xf32>
    %10 = arith.addf %6, %9 : vector<128x8xf32>
    %11 = arith.truncf %10 : vector<128x8xf32> to vector<128x8xbf16>
    %c0_8 = arith.constant 0 : index
    %c0_9 = arith.constant 0 : index
    %12 = vector.load %arg5[%c0_8, %c0_9] : memref<8x24xbf16, #tpu.memory_space<vmem>>, vector<8x24xbf16>
    %cst = arith.constant dense<0.000000e+00> : vector<128x24xf32>
    %13 = tpu.matmul %11, %12, %cst {dimension_numbers = #tpu.dot_dimension_numbers<[1], [0], [0], [1], [0, 0, 1, 1], [], []>} : vector<128x8xbf16>, vector<8x24xbf16>, vector<128x24xf32> -> vector<128x24xf32>
    %c0_10 = arith.constant 0 : index
    %c0_11 = arith.constant 0 : index
    %14 = vector.load %arg6[%c0_10, %c0_11] : memref<1x24xf32, #tpu.memory_space<vmem>>, vector<1x24xf32>
    %15 = vector.broadcast %14 : vector<1x24xf32> to vector<128x24xf32>
    %16 = arith.addf %13, %15 : vector<128x24xf32>
    %17 = vector.extract_strided_slice %16 {offsets = [0, 0], sizes = [128, 8], strides = [1, 1]} : vector<128x24xf32> to vector<128x8xf32>
    %18 = arith.truncf %17 : vector<128x8xf32> to vector<128x8xbf16>
    %c0_12 = arith.constant 0 : index
    %c0_13 = arith.constant 0 : index
    %c0_14 = arith.constant 0 : index
    %19 = vector.load %arg7[%c0_12, %c0_13, %c0_14] : memref<1x128x8xbf16, #tpu.memory_space<vmem>>, vector<1x128x8xbf16>
    %20 = vector.shape_cast %19 : vector<1x128x8xbf16> to vector<128x8xbf16>
    %21 = vector.shape_cast %18 : vector<128x8xbf16> to vector<1x128x8xbf16>
    tpu.vector_store %arg7[%c0_12, %c0_13, %c0_14], %21 {strides = array<i32>} : memref<1x128x8xbf16, #tpu.memory_space<vmem>>, vector<1x128x8xbf16>,
    %22 = vector.extract_strided_slice %16 {offsets = [0, 8], sizes = [128, 8], strides = [1, 1]} : vector<128x24xf32> to vector<128x8xf32>
    %23 = arith.truncf %22 : vector<128x8xf32> to vector<128x8xbf16>
    %c0_15 = arith.constant 0 : index
    %c0_16 = arith.constant 0 : index
    %c0_17 = arith.constant 0 : index
    %24 = vector.load %arg8[%c0_15, %c0_16, %c0_17] : memref<1x128x8xbf16, #tpu.memory_space<vmem>>, vector<1x128x8xbf16>
    %25 = vector.shape_cast %24 : vector<1x128x8xbf16> to vector<128x8xbf16>
    %26 = vector.shape_cast %23 : vector<128x8xbf16> to vector<1x128x8xbf16>
    tpu.vector_store %arg8[%c0_15, %c0_16, %c0_17], %26 {strides = array<i32>} : memref<1x128x8xbf16, #tpu.memory_space<vmem>>, vector<1x128x8xbf16>,
    %27 = vector.extract_strided_slice %16 {offsets = [0, 16], sizes = [128, 8], strides = [1, 1]} : vector<128x24xf32> to vector<128x8xf32>
    %28 = arith.truncf %27 : vector<128x8xf32> to vector<128x8xbf16>
    %c0_18 = arith.constant 0 : index
    %c0_19 = arith.constant 0 : index
    %c0_20 = arith.constant 0 : index
    %29 = vector.load %arg9[%c0_18, %c0_19, %c0_20] : memref<1x128x8xbf16, #tpu.memory_space<vmem>>, vector<1x128x8xbf16>
    %30 = vector.shape_cast %29 : vector<1x128x8xbf16> to vector<128x8xbf16>
    %31 = vector.shape_cast %28 : vector<128x8xbf16> to vector<1x128x8xbf16>
    tpu.vector_store %arg9[%c0_18, %c0_19, %c0_20], %31 {strides = array<i32>} : memref<1x128x8xbf16, #tpu.memory_space<vmem>>, vector<1x128x8xbf16>,
    return
  }
  func.func @transform_0(%arg0: i32, %arg1: i32) -> (i32, i32, i32) {
    %c0_i32 = arith.constant 0 : i32
    %c0_i32_0 = arith.constant 0 : i32
    return %arg0, %c0_i32, %arg1 : i32, i32, i32
  }
  func.func @transform_1(%arg0: i32, %arg1: i32) -> (i32, i32, i32) {
    %c0_i32 = arith.constant 0 : i32
    %c0_i32_0 = arith.constant 0 : i32
    %c0_i32_1 = arith.constant 0 : i32
    return %arg0, %c0_i32, %c0_i32_0 : i32, i32, i32
  }
  func.func @transform_2(%arg0: i32, %arg1: i32) -> (i32, i32, i32) {
    %c0_i32 = arith.constant 0 : i32
    %c0_i32_0 = arith.constant 0 : i32
    %c0_i32_1 = arith.constant 0 : i32
    return %arg0, %c0_i32, %c0_i32_0 : i32, i32, i32
  }
  func.func @transform_3(%arg0: i32, %arg1: i32) -> (i32, i32) {
    %c0_i32 = arith.constant 0 : i32
    %c0_i32_0 = arith.constant 0 : i32
    %c0_i32_1 = arith.constant 0 : i32
    return %c0_i32, %c0_i32_0 : i32, i32
  }
  func.func @transform_4(%arg0: i32, %arg1: i32) -> (i32, i32) {
    %c0_i32 = arith.constant 0 : i32
    %c0_i32_0 = arith.constant 0 : i32
    %c0_i32_1 = arith.constant 0 : i32
    return %c0_i32, %c0_i32_0 : i32, i32
  }
  func.func @transform_5(%arg0: i32, %arg1: i32) -> (i32, i32, i32) {
    %c0_i32 = arith.constant 0 : i32
    %c0_i32_0 = arith.constant 0 : i32
    return %arg0, %arg1, %c0_i32 : i32, i32, i32
  }
  func.func @transform_6(%arg0: i32, %arg1: i32) -> (i32, i32, i32) {
    %c0_i32 = arith.constant 0 : i32
    %c0_i32_0 = arith.constant 0 : i32
    return %arg0, %arg1, %c0_i32 : i32, i32, i32
  }
  func.func @transform_7(%arg0: i32, %arg1: i32) -> (i32, i32, i32) {
    %c0_i32 = arith.constant 0 : i32
    %c0_i32_0 = arith.constant 0 : i32
    return %arg0, %arg1, %c0_i32 : i32, i32, i32
  }
}

module attributes {stable_mosaic.version = 11 : i64} {
  func.func @flash_attn_kernel(%arg0: i32, %arg1: i32, %arg2: i32, %arg3: memref<1x8x128xf32, #tpu.memory_space<vmem>>, %arg4: memref<1x128x8xbf16, #tpu.memory_space<vmem>>, %arg5: memref<1x128x8xbf16, #tpu.memory_space<vmem>>, %arg6: memref<1x128x8xbf16, #tpu.memory_space<vmem>>, %arg7: memref<8x8xbf16, #tpu.memory_space<vmem>>, %arg8: memref<1x8xf32, #tpu.memory_space<vmem>>, %arg9: memref<1x8x128xf32, #tpu.memory_space<vmem>>, %arg10: memref<128x1xf32, #tpu.memory_space<vmem>>, %arg11: memref<128x1xf32, #tpu.memory_space<vmem>>, %arg12: memref<128x8xf32, #tpu.memory_space<vmem>>) attributes {dimension_semantics = [#tpu.dimension_semantics<parallel>, #tpu.dimension_semantics<parallel>, #tpu.dimension_semantics<arbitrary>], iteration_bounds = array<i64: 2, 1, 1>, scalar_prefetch = 0 : i64, scratch_operands = 3 : i64, tpu.core_type = #tpu.core_type<tc>, window_params = [{transform_indices = @transform_0, window_bounds = array<i64: 1, 8, 128>}, {transform_indices = @transform_1, window_bounds = array<i64: 1, 128, 8>}, {transform_indices = @transform_2, window_bounds = array<i64: 1, 128, 8>}, {transform_indices = @transform_3, window_bounds = array<i64: 1, 128, 8>}, {pipeline_mode = #tpu.pipeline_mode<synchronous>, transform_indices = @transform_4, window_bounds = array<i64: 8, 8>}, {pipeline_mode = #tpu.pipeline_mode<synchronous>, transform_indices = @transform_5, window_bounds = array<i64: 1, 8>}, {transform_indices = @transform_6, window_bounds = array<i64: 1, 8, 128>}]} {
    %c0_i32 = arith.constant 0 : i32
    %0 = arith.cmpi eq, %arg2, %c0_i32 : i32
    %1 = arith.extui %0 : i1 to i32
    %c0_i32_0 = arith.constant 0 : i32
    %2 = arith.cmpi ne, %1, %c0_i32_0 : i32
    scf.if %2 {
      %cst_29 = arith.constant -1.000000e+30 : f32
      %51 = vector.broadcast %cst_29 : f32 to vector<128x1xf32>
      %c0_30 = arith.constant 0 : index
      %c0_31 = arith.constant 0 : index
      %52 = vector.load %arg10[%c0_30, %c0_31] : memref<128x1xf32, #tpu.memory_space<vmem>>, vector<128x1xf32>
      tpu.vector_store %arg10[%c0_30, %c0_31], %51 {strides = array<i32>} : memref<128x1xf32, #tpu.memory_space<vmem>>, vector<128x1xf32>,
      %cst_32 = arith.constant 0.000000e+00 : f32
      %53 = vector.broadcast %cst_32 : f32 to vector<128x1xf32>
      %c0_33 = arith.constant 0 : index
      %c0_34 = arith.constant 0 : index
      %54 = vector.load %arg11[%c0_33, %c0_34] : memref<128x1xf32, #tpu.memory_space<vmem>>, vector<128x1xf32>
      tpu.vector_store %arg11[%c0_33, %c0_34], %53 {strides = array<i32>} : memref<128x1xf32, #tpu.memory_space<vmem>>, vector<128x1xf32>,
      %cst_35 = arith.constant 0.000000e+00 : f32
      %55 = vector.broadcast %cst_35 : f32 to vector<128x8xf32>
      %c0_36 = arith.constant 0 : index
      %c0_37 = arith.constant 0 : index
      %56 = vector.load %arg12[%c0_36, %c0_37] : memref<128x8xf32, #tpu.memory_space<vmem>>, vector<128x8xf32>
      tpu.vector_store %arg12[%c0_36, %c0_37], %55 {strides = array<i32>} : memref<128x8xf32, #tpu.memory_space<vmem>>, vector<128x8xf32>,
    } else {
    }
    %c0 = arith.constant 0 : index
    %c0_1 = arith.constant 0 : index
    %c0_2 = arith.constant 0 : index
    %3 = vector.load %arg4[%c0, %c0_1, %c0_2] : memref<1x128x8xbf16, #tpu.memory_space<vmem>>, vector<1x128x8xbf16>
    %4 = vector.shape_cast %3 : vector<1x128x8xbf16> to vector<128x8xbf16>
    %c128_i32 = arith.constant 128 : i32
    %5 = arith.muli %arg2, %c128_i32 : i32
    %c0_3 = arith.constant 0 : index
    %c0_4 = arith.constant 0 : index
    %c0_5 = arith.constant 0 : index
    %6 = vector.load %arg5[%c0_3, %c0_4, %c0_5] : memref<1x128x8xbf16, #tpu.memory_space<vmem>>, vector<1x128x8xbf16>
    %7 = vector.shape_cast %6 : vector<1x128x8xbf16> to vector<128x8xbf16>
    %c0_6 = arith.constant 0 : index
    %c0_7 = arith.constant 0 : index
    %c0_8 = arith.constant 0 : index
    %8 = vector.load %arg6[%c0_6, %c0_7, %c0_8] : memref<1x128x8xbf16, #tpu.memory_space<vmem>>, vector<1x128x8xbf16>
    %9 = vector.shape_cast %8 : vector<1x128x8xbf16> to vector<128x8xbf16>
    %cst = arith.constant dense<0.000000e+00> : vector<128x128xf32>
    %10 = tpu.matmul %4, %7, %cst {dimension_numbers = #tpu.dot_dimension_numbers<[1], [1], [0], [0], [0, 0, 1, 0], [], []>} : vector<128x8xbf16>, vector<128x8xbf16>, vector<128x128xf32> -> vector<128x128xf32>
    %c0_i32_9 = arith.constant 0 : i32
    %11 = arith.addi %5, %c0_i32_9 : i32
    %12 = tpu.iota {dimensions = array<i32: 1>} : vector<1x128xi32>
    %13 = vector.broadcast %11 : i32 to vector<1x128xi32>
    %14 = arith.addi %13, %12 : vector<1x128xi32>
    %c64_i32 = arith.constant 64 : i32
    %15 = vector.broadcast %c64_i32 : i32 to vector<1x128xi32>
    %16 = arith.cmpi slt, %14, %15 : vector<1x128xi32>
    %cst_10 = arith.constant -1.000000e+30 : f32
    %17 = vector.shape_cast %16 : vector<1x128xi1> to vector<1x128xi1>
    %18 = vector.broadcast %17 : vector<1x128xi1> to vector<128x128xi1>
    %19 = vector.broadcast %cst_10 : f32 to vector<128x128xf32>
    %20 = arith.select %18, %10, %19 : vector<128x128xi1>, vector<128x128xf32>
    %c0_11 = arith.constant 0 : index
    %c0_12 = arith.constant 0 : index
    %21 = vector.load %arg10[%c0_11, %c0_12] : memref<128x1xf32, #tpu.memory_space<vmem>>, vector<128x1xf32>
    %cst_13 = arith.constant dense<0xFF800000> : vector<128xf32>
    %22 = vector.multi_reduction <maximumf>, %20, %cst_13 [1] : vector<128x128xf32> to vector<128xf32>
    %23 = vector.shape_cast %22 : vector<128xf32> to vector<128x1xf32>
    %24 = arith.maximumf %21, %23 : vector<128x1xf32>
    %25 = arith.subf %21, %24 : vector<128x1xf32>
    %26 = math.exp %25 : vector<128x1xf32>
    %27 = vector.broadcast %24 : vector<128x1xf32> to vector<128x128xf32>
    %28 = arith.subf %20, %27 : vector<128x128xf32>
    %29 = math.exp %28 : vector<128x128xf32>
    %cst_14 = arith.constant 0.000000e+00 : f32
    %30 = vector.shape_cast %16 : vector<1x128xi1> to vector<1x128xi1>
    %31 = vector.broadcast %30 : vector<1x128xi1> to vector<128x128xi1>
    %32 = vector.broadcast %cst_14 : f32 to vector<128x128xf32>
    %33 = arith.select %31, %29, %32 : vector<128x128xi1>, vector<128x128xf32>
    %c0_15 = arith.constant 0 : index
    %c0_16 = arith.constant 0 : index
    %34 = vector.load %arg11[%c0_15, %c0_16] : memref<128x1xf32, #tpu.memory_space<vmem>>, vector<128x1xf32>
    %35 = arith.mulf %26, %34 : vector<128x1xf32>
    %cst_17 = arith.constant dense<0.000000e+00> : vector<128xf32>
    %36 = vector.multi_reduction <add>, %33, %cst_17 [1] : vector<128x128xf32> to vector<128xf32>
    %37 = vector.shape_cast %36 : vector<128xf32> to vector<128x1xf32>
    %38 = arith.addf %35, %37 : vector<128x1xf32>
    %c0_18 = arith.constant 0 : index
    %c0_19 = arith.constant 0 : index
    %39 = vector.load %arg11[%c0_18, %c0_19] : memref<128x1xf32, #tpu.memory_space<vmem>>, vector<128x1xf32>
    tpu.vector_store %arg11[%c0_18, %c0_19], %38 {strides = array<i32>} : memref<128x1xf32, #tpu.memory_space<vmem>>, vector<128x1xf32>,
    %c0_20 = arith.constant 0 : index
    %c0_21 = arith.constant 0 : index
    %40 = vector.load %arg12[%c0_20, %c0_21] : memref<128x8xf32, #tpu.memory_space<vmem>>, vector<128x8xf32>
    %41 = vector.broadcast %26 : vector<128x1xf32> to vector<128x8xf32>
    %42 = arith.mulf %41, %40 : vector<128x8xf32>
    %43 = arith.truncf %33 : vector<128x128xf32> to vector<128x128xbf16>
    %cst_22 = arith.constant dense<0.000000e+00> : vector<128x8xf32>
    %44 = tpu.matmul %43, %9, %cst_22 {dimension_numbers = #tpu.dot_dimension_numbers<[1], [0], [0], [1], [0, 0, 1, 1], [], []>} : vector<128x128xbf16>, vector<128x8xbf16>, vector<128x8xf32> -> vector<128x8xf32>
    %45 = arith.addf %42, %44 : vector<128x8xf32>
    %c0_23 = arith.constant 0 : index
    %c0_24 = arith.constant 0 : index
    %46 = vector.load %arg12[%c0_23, %c0_24] : memref<128x8xf32, #tpu.memory_space<vmem>>, vector<128x8xf32>
    tpu.vector_store %arg12[%c0_23, %c0_24], %45 {strides = array<i32>} : memref<128x8xf32, #tpu.memory_space<vmem>>, vector<128x8xf32>,
    %c0_25 = arith.constant 0 : index
    %c0_26 = arith.constant 0 : index
    %47 = vector.load %arg10[%c0_25, %c0_26] : memref<128x1xf32, #tpu.memory_space<vmem>>, vector<128x1xf32>
    tpu.vector_store %arg10[%c0_25, %c0_26], %24 {strides = array<i32>} : memref<128x1xf32, #tpu.memory_space<vmem>>, vector<128x1xf32>,
    %c0_i32_27 = arith.constant 0 : i32
    %48 = arith.cmpi eq, %arg2, %c0_i32_27 : i32
    %49 = arith.extui %48 : i1 to i32
    %c0_i32_28 = arith.constant 0 : i32
    %50 = arith.cmpi ne, %49, %c0_i32_28 : i32
    scf.if %50 {
      %c0_29 = arith.constant 0 : index
      %c0_30 = arith.constant 0 : index
      %51 = vector.load %arg12[%c0_29, %c0_30] : memref<128x8xf32, #tpu.memory_space<vmem>>, vector<128x8xf32>
      %c0_31 = arith.constant 0 : index
      %c0_32 = arith.constant 0 : index
      %52 = vector.load %arg11[%c0_31, %c0_32] : memref<128x1xf32, #tpu.memory_space<vmem>>, vector<128x1xf32>
      %53 = tpu.reciprocal %52 : vector<128x1xf32> -> vector<128x1xf32>
      %54 = vector.broadcast %53 : vector<128x1xf32> to vector<128x8xf32>
      %55 = arith.mulf %51, %54 : vector<128x8xf32>
      %56 = arith.truncf %55 : vector<128x8xf32> to vector<128x8xbf16>
      %c0_33 = arith.constant 0 : index
      %c0_34 = arith.constant 0 : index
      %57 = vector.load %arg7[%c0_33, %c0_34] : memref<8x8xbf16, #tpu.memory_space<vmem>>, vector<8x8xbf16>
      %cst_35 = arith.constant dense<0.000000e+00> : vector<128x8xf32>
      %58 = tpu.matmul %56, %57, %cst_35 {dimension_numbers = #tpu.dot_dimension_numbers<[1], [0], [0], [1], [0, 0, 1, 1], [], []>} : vector<128x8xbf16>, vector<8x8xbf16>, vector<128x8xf32> -> vector<128x8xf32>
      %c0_36 = arith.constant 0 : index
      %c0_37 = arith.constant 0 : index
      %59 = vector.load %arg8[%c0_36, %c0_37] : memref<1x8xf32, #tpu.memory_space<vmem>>, vector<1x8xf32>
      %60 = vector.broadcast %59 : vector<1x8xf32> to vector<128x8xf32>
      %61 = arith.addf %58, %60 : vector<128x8xf32>
      %c0_38 = arith.constant 0 : index
      %c0_39 = arith.constant 0 : index
      %c0_40 = arith.constant 0 : index
      %62 = vector.load %arg3[%c0_38, %c0_39, %c0_40] : memref<1x8x128xf32, #tpu.memory_space<vmem>>, vector<1x8x128xf32>
      %63 = vector.shape_cast %62 : vector<1x8x128xf32> to vector<8x128xf32>
      %64 = tpu.transpose %61, [1, 0] : vector<128x8xf32> -> vector<8x128xf32>
      %65 = arith.addf %63, %64 : vector<8x128xf32>
      %c0_41 = arith.constant 0 : index
      %c0_42 = arith.constant 0 : index
      %c0_43 = arith.constant 0 : index
      %66 = vector.load %arg9[%c0_41, %c0_42, %c0_43] : memref<1x8x128xf32, #tpu.memory_space<vmem>>, vector<1x8x128xf32>
      %67 = vector.shape_cast %66 : vector<1x8x128xf32> to vector<8x128xf32>
      %68 = vector.shape_cast %65 : vector<8x128xf32> to vector<1x8x128xf32>
      tpu.vector_store %arg9[%c0_41, %c0_42, %c0_43], %68 {strides = array<i32>} : memref<1x8x128xf32, #tpu.memory_space<vmem>>, vector<1x8x128xf32>,
    } else {
    }
    return
  }
  func.func @transform_0(%arg0: i32, %arg1: i32, %arg2: i32) -> (i32, i32, i32) {
    %c0_i32 = arith.constant 0 : i32
    %c0_i32_0 = arith.constant 0 : i32
    return %arg0, %c0_i32, %arg1 : i32, i32, i32
  }
  func.func @transform_1(%arg0: i32, %arg1: i32, %arg2: i32) -> (i32, i32, i32) {
    %c0_i32 = arith.constant 0 : i32
    %c0_i32_0 = arith.constant 0 : i32
    return %arg0, %arg1, %c0_i32 : i32, i32, i32
  }
  func.func @transform_2(%arg0: i32, %arg1: i32, %arg2: i32) -> (i32, i32, i32) {
    %c0_i32 = arith.constant 0 : i32
    %c0_i32_0 = arith.constant 0 : i32
    return %arg0, %arg2, %c0_i32 : i32, i32, i32
  }
  func.func @transform_3(%arg0: i32, %arg1: i32, %arg2: i32) -> (i32, i32, i32) {
    %c0_i32 = arith.constant 0 : i32
    %c0_i32_0 = arith.constant 0 : i32
    return %arg0, %arg2, %c0_i32 : i32, i32, i32
  }
  func.func @transform_4(%arg0: i32, %arg1: i32, %arg2: i32) -> (i32, i32) {
    %c0_i32 = arith.constant 0 : i32
    %c0_i32_0 = arith.constant 0 : i32
    %c0_i32_1 = arith.constant 0 : i32
    return %c0_i32, %c0_i32_0 : i32, i32
  }
  func.func @transform_5(%arg0: i32, %arg1: i32, %arg2: i32) -> (i32, i32) {
    %c0_i32 = arith.constant 0 : i32
    %c0_i32_0 = arith.constant 0 : i32
    %c0_i32_1 = arith.constant 0 : i32
    return %c0_i32, %c0_i32_0 : i32, i32
  }
  func.func @transform_6(%arg0: i32, %arg1: i32, %arg2: i32) -> (i32, i32, i32) {
    %c0_i32 = arith.constant 0 : i32
    %c0_i32_0 = arith.constant 0 : i32
    return %arg0, %c0_i32, %arg1 : i32, i32, i32
  }
}

</mosaic_0001>

<bundles_post_ra>
// kernel: attn_blockpp.2
= control target key start
LH: loop header
LB: loop body
LE: loop exit
PB: predicated region body
PF: predicated region fallthrough
CT: control target
= control target key end

     0   :  { %s1053_s24 = smov 0   ;;  %s1055_s25 = smov 0   ;;  %s1275_s0 = inlined_call_operand.vmem [shape: f32[2,8,128], index: 0, kind: input, shape index: {}]   ;;  %s1276_s1 = inlined_call_operand.vmem [shape: f32[2,1,8], index: 1, kind: input, shape index: {}]   ;;  %s1277_s2 = inlined_call_operand.vmem [shape: f32[2,1,8], index: 2, kind: input, shape index: {}]   ;;  %s1278_s3 = inlined_call_operand.vmem [shape: bf16[8,24], index: 3, kind: input, shape index: {}]   ;;  %s1279_s4 = inlined_call_operand.vmem [shape: f32[1,24], index: 4, kind: input, shape index: {}]   ;;  %s1280_s5 = inlined_call_operand.vmem [shape: bf16[2,128,8], index: 5, kind: output, shape index: {0}]   ;;  %s1281_s6 = inlined_call_operand.vmem [shape: bf16[2,128,8], index: 6, kind: output, shape index: {1}]   ;;  %s1282_s7 = inlined_call_operand.vmem [shape: bf16[2,128,8], index: 7, kind: output, shape index: {2}]  }
   0x1   :  { %s1057_s26 = smov 0  }
   0x2 LB: > { %s30_s27 = sadd.s32 1, %s1005_s25  ;;  %p933_p0 = scmp.ge.s32.totalorder %s1009_s26, 1  ;;  %s1009_s26 = sphi %s1057_s26, %s18_s26   ;;  %s1005_s25 = sphi %s1055_s25, %s1284_s25   ;;  %s1001_s24 = sphi %s1053_s24, %s1283_s24  }
   0x3   : > { %p32_p1 = scmp.ge.s32.totalorder %s30_s27, 2  ;;  %p280_p2 = scmp.lt.s32.totalorder %s1009_s26, 3 }
   0x5   : > { %s1286_s27 = smov (%p32_p1, %s30_s27), 0  ;;  %p281_p3 = pnand %p933_p0, %p280_p2 }
   0x6   : > { %p342_p4 = scmp.lt.s32.totalorder (!%p281_p3), %s1001_s24, 1  ;;  %s1011_s23 = smov (!%p281_p3), 112  }
   0x7   : > { %284 = sbr.rel (%p281_p3) target bundleno = 575 (0x23f), region = 40 }
   0xc   : > { %s1288_s24 = smov (!%p342_p4, %s1001_s24), 1  ;;  %v467_v1 = vld [vmem:[%s1278_s3] sm:$0xf]  ;;  %vm497_vm0 = vcmask 1043456   ;;  %vm472_vm1 = vcmask 64512   ;;  %vm566_vm2 = vcmask 60416  }
   0xd   : > { %s934_s28 = sshll.u32 %s1288_s24, 3  ;;  %s351_s8 = scalar_lea.vmem %s1276_s1, %s1288_s24  ;;  %v499_v2 = vsel %vm497_vm0, %v467_v1, 0  ;;  %v1099_v61 = vld [vmem:[%s1279_s4] ss:$0 sm:$0xff] }
   0xe   : > { %s348_s11 = scalar_lea.vmem %s1275_s0, %s934_s28  ;;  %s354_s14 = scalar_lea.vmem %s1277_s2, %s1288_s24  ;;  %508 = vmatpush.bf16.msra.mxu0 %v499_v2  ;;  %954 = vmatpush.bf16.msra.mxu1 %v499_v2  ;;  %v984_v4 = vld [vmem:[%s351_s8] ss:$0 sm:$0xff] }
   0xf   : > { %v386_v0 = vld [vmem:[%s348_s11] sm:$0xff]  ;;  %955 = vmatpush.bf16.msra.mxu2 %v499_v2  ;;  %956 = vmatpush.bf16.msra.mxu3 %v499_v2  ;;  %s1102_s19 = sshll.u32 %s1288_s24, 6  ;;  %s1012_s24 = smov 120  }
  0x10   : > { %387 = vxpose.xlu0.b32.start.end [1/1] (short) %v386_v0, 128  ;;  %v985_v5 = vld [vmem:[%s354_s14] ss:$0 sm:$0xff]  ;;  %s1108_s22 = scalar_lea.vmem %s1280_s5, %s1102_s19  ;;  %s1168_s30 = scalar_lea.vmem %s1282_s7, %s1102_s19 }
  0x11   : > { %s1193_s10 = scalar_lea.vmem %s1281_s6, %s1102_s19 }
  0xb4   : > { %v403_v3 = vpop.trf.xlu0 }
  0xb5   : > { %v423_v6 = vmul.f32 %v984_v4, %v403_v3 }
  0xb7   : > { %v443_v9 = vadd.f32 %v985_v5, %v423_v6 }
  0xbc   : > { %v404_v7 = vpop.trf.xlu0 }
  0xbd   : > { %v424_v8 = vmul.f32 %v984_v4, %v404_v7 }
  0xbf   : > { %v444_v10 = vadd.f32 %v985_v5, %v424_v8 }
  0xc1   : > { %v459_v11 = vpack.c.bf16 %v444_v10, %v443_v9 }
  0xc3   : > { %941 = vmatmul.msk.bf16.vlgmr.msra.gmra.mxu0 %vm472_vm1, %v459_v11 }
  0xc4   : > { %v405_v12 = vpop.trf.xlu0 }
  0xc5   : > { %v425_v13 = vmul.f32 %v984_v4, %v405_v12 }
  0xc7   : > { %v445_v16 = vadd.f32 %v985_v5, %v425_v13 }
  0xcc   : > { %v406_v14 = vpop.trf.xlu0 }
  0xcd   : > { %v426_v15 = vmul.f32 %v984_v4, %v406_v14 }
  0xcf   : > { %v446_v17 = vadd.f32 %v985_v5, %v426_v15 }
  0xd1   : > { %v460_v18 = vpack.c.bf16 %v446_v17, %v445_v16 }
  0xd3   : > { %942 = vmatmul.msk.bf16.gmra.mxu0 %vm472_vm1, %v460_v18 }
  0xd4   : > { %v407_v19 = vpop.trf.xlu0 }
  0xd5   : > { %v427_v20 = vmul.f32 %v984_v4, %v407_v19 }
  0xd7   : > { %v447_v23 = vadd.f32 %v985_v5, %v427_v20 }
  0xdc   : > { %v408_v21 = vpop.trf.xlu0 }
  0xdd   : > { %v428_v22 = vmul.f32 %v984_v4, %v408_v21 }
  0xdf   : > { %v448_v24 = vadd.f32 %v985_v5, %v428_v22 }
  0xe1   : > { %v461_v25 = vpack.c.bf16 %v448_v24, %v447_v23 }
  0xe3   : > { %943 = vmatmul.msk.bf16.vlgmr.msra.gmra.mxu1 %vm472_vm1, %v461_v25 }
  0xe4   : > { %v409_v26 = vpop.trf.xlu0 }
  0xe5   : > { %v429_v27 = vmul.f32 %v984_v4, %v409_v26 }
  0xe7   : > { %v449_v30 = vadd.f32 %v985_v5, %v429_v27 }
  0xec   : > { %v410_v28 = vpop.trf.xlu0 }
  0xed   : > { %v430_v29 = vmul.f32 %v984_v4, %v410_v28 }
  0xef   : > { %v450_v31 = vadd.f32 %v985_v5, %v430_v29 }
  0xf1   : > { %v462_v32 = vpack.c.bf16 %v450_v31, %v449_v30 }
  0xf3   : > { %944 = vmatmul.msk.bf16.gmra.mxu1 %vm472_vm1, %v462_v32 }
  0xf4   : > { %v411_v33 = vpop.trf.xlu0 }
  0xf5   : > { %v431_v34 = vmul.f32 %v984_v4, %v411_v33 }
  0xf7   : > { %v451_v37 = vadd.f32 %v985_v5, %v431_v34 }
  0xfc   : > { %v412_v35 = vpop.trf.xlu0 }
  0xfd   : > { %v432_v36 = vmul.f32 %v984_v4, %v412_v35 }
  0xff   : > { %v452_v38 = vadd.f32 %v985_v5, %v432_v36 }
 0x101   : > { %v463_v39 = vpack.c.bf16 %v452_v38, %v451_v37 }
 0x103   : > { %945 = vmatmul.msk.bf16.vlgmr.msra.gmra.mxu2 %vm472_vm1, %v463_v39 }
 0x104   : > { %v413_v40 = vpop.trf.xlu0 }
 0x105   : > { %v433_v41 = vmul.f32 %v984_v4, %v413_v40 }
 0x107   : > { %v453_v44 = vadd.f32 %v985_v5, %v433_v41 }
 0x10c   : > { %v414_v42 = vpop.trf.xlu0 }
 0x10d   : > { %v434_v43 = vmul.f32 %v984_v4, %v414_v42 }
 0x10f   : > { %v454_v45 = vadd.f32 %v985_v5, %v434_v43 }
 0x111   : > { %v464_v46 = vpack.c.bf16 %v454_v45, %v453_v44 }
 0x113   : > { %946 = vmatmul.msk.bf16.gmra.mxu2 %vm472_vm1, %v464_v46 }
 0x114   : > { %v415_v47 = vpop.trf.xlu0 }
 0x115   : > { %v435_v48 = vmul.f32 %v984_v4, %v415_v47 }
 0x117   : > { %v455_v51 = vadd.f32 %v985_v5, %v435_v48 }
 0x11c   : > { %v416_v49 = vpop.trf.xlu0 }
 0x11d   : > { %v436_v50 = vmul.f32 %v984_v4, %v416_v49 }
 0x11f   : > { %v456_v52 = vadd.f32 %v985_v5, %v436_v50 }
 0x121   : > { %v465_v53 = vpack.c.bf16 %v456_v52, %v455_v51 }
 0x123   : > { %947 = vmatmul.msk.bf16.vlgmr.msra.gmra.mxu3 %vm472_vm1, %v465_v53 }
 0x124   : > { %v417_v54 = vpop.trf.xlu0 }
 0x125   : > { %v437_v55 = vmul.f32 %v984_v4, %v417_v54 }
 0x127   : > { %v457_v58 = vadd.f32 %v985_v5, %v437_v55 }
 0x12c   : > { %v418_v56 = vpop.trf.xlu0 }
 0x12d   : > { %v438_v57 = vmul.f32 %v984_v4, %v418_v56 }
 0x12f   : > { %v458_v59 = vadd.f32 %v985_v5, %v438_v57 }
 0x131   : > { %v466_v60 = vpack.c.bf16 %v458_v59, %v457_v58 }
 0x133   : > { %948 = vmatmul.msk.bf16.gmra.mxu3 %vm472_vm1, %v466_v60 }
 0x140   : > { %v510_v62 = vpop.f32.mrf.mxu0 }
 0x141   : > { %v511_v63 = vadd.f32 %v1099_v61, %v510_v62 }
 0x143   : > { %v550_v0 = vpack.c.bf16 %v511_v63, %v511_v63 }
 0x145   : > { %567 = vst.msk [vmem:[%s1108_s22] sm:$0xf] %vm566_vm2, %v550_v0  ;;  %663 = vrot.lane.b32.xlu2 %v550_v0, %s1011_s23  ;;  %599 = vrot.lane.b32.xlu0 %v550_v0, %s1012_s24 }
 0x148   : > { %v512_v1 = vpop.f32.mrf.mxu0 }
 0x149   : > { %v513_v2 = vadd.f32 %v1099_v61, %v512_v1 }
 0x14b   : > { %v551_v3 = vpack.c.bf16 %v513_v2, %v513_v2 }
 0x14d   : > { %568 = vst.msk [vmem:[%s1108_s22 + $0x4] sm:$0xf] %vm566_vm2, %v551_v3  ;;  %601 = vrot.lane.b32.xlu1 %v551_v3, %s1012_s24 }
 0x150   : > { %v515_v4 = vpop.f32.mrf.mxu0 }
 0x151   : > { %v516_v5 = vadd.f32 %v1099_v61, %v515_v4 }
 0x153   : > { %v552_v6 = vpack.c.bf16 %v516_v5, %v516_v5 }
 0x155   : > { %569 = vst.msk [vmem:[%s1108_s22 + $0x8] sm:$0xf] %vm566_vm2, %v552_v6  ;;  %665 = vrot.lane.b32.xlu1 %v551_v3, %s1011_s23  ;;  %667 = vrot.lane.b32.xlu2 %v552_v6, %s1011_s23 }
 0x158   : > { %v517_v7 = vpop.f32.mrf.mxu0 }
 0x159   : > { %v518_v8 = vadd.f32 %v1099_v61, %v517_v7 }
 0x15b   : > { %v553_v9 = vpack.c.bf16 %v518_v8, %v518_v8 }
 0x15d   : > { %570 = vst.msk [vmem:[%s1108_s22 + $0xc] sm:$0xf] %vm566_vm2, %v553_v9  ;;  %605 = vrot.lane.b32.xlu2 %v553_v9, %s1012_s24  ;;  %603 = vrot.lane.b32.xlu1 %v552_v6, %s1012_s24 }
 0x160   : > { %v520_v10 = vpop.f32.mrf.mxu1 }
 0x161   : > { %v521_v11 = vadd.f32 %v1099_v61, %v520_v10 }
 0x163   : > { %v554_v12 = vpack.c.bf16 %v521_v11, %v521_v11 }
 0x165   : > { %571 = vst.msk [vmem:[%s1108_s22 + $0x10] sm:$0xf] %vm566_vm2, %v554_v12  ;;  %669 = vrot.lane.b32.xlu1 %v553_v9, %s1011_s23  ;;  %607 = vrot.lane.b32.xlu2 %v554_v12, %s1012_s24 }
 0x168   : > { %v522_v13 = vpop.f32.mrf.mxu1 }
 0x169   : > { %v523_v14 = vadd.f32 %v1099_v61, %v522_v13 }
 0x16b   : > { %v555_v15 = vpack.c.bf16 %v523_v14, %v523_v14 }
 0x16d   : > { %572 = vst.msk [vmem:[%s1108_s22 + $0x14] sm:$0xf] %vm566_vm2, %v555_v15  ;;  %609 = vrot.lane.b32.xlu1 %v555_v15, %s1012_s24  ;;  %671 = vrot.lane.b32.xlu2 %v554_v12, %s1011_s23 }
 0x170   : > { %v525_v16 = vpop.f32.mrf.mxu1 }
 0x171   : > { %v526_v17 = vadd.f32 %v1099_v61, %v525_v16 }
 0x173   : > { %v556_v18 = vpack.c.bf16 %v526_v17, %v526_v17 }
 0x175   : > { %573 = vst.msk [vmem:[%s1108_s22 + $0x18] sm:$0xf] %vm566_vm2, %v556_v18  ;;  %673 = vrot.lane.b32.xlu1 %v555_v15, %s1011_s23  ;;  %611 = vrot.lane.b32.xlu2 %v556_v18, %s1012_s24 }
 0x178   : > { %v527_v19 = vpop.f32.mrf.mxu1 }
 0x179   : > { %v528_v20 = vadd.f32 %v1099_v61, %v527_v19 }
 0x17b   : > { %v557_v21 = vpack.c.bf16 %v528_v20, %v528_v20 }
 0x17d   : > { %574 = vst.msk [vmem:[%s1108_s22 + $0x1c] sm:$0xf] %vm566_vm2, %v557_v21  ;;  %613 = vrot.lane.b32.xlu1 %v557_v21, %s1012_s24  ;;  %675 = vrot.lane.b32.xlu2 %v556_v18, %s1011_s23 }
 0x185   : > { %677 = vrot.lane.b32.xlu1 %v557_v21, %s1011_s23 }
 0x186   : > { %v530_v22 = vpop.f32.mrf.mxu2 }
 0x187   : > { %v531_v23 = vadd.f32 %v1099_v61, %v530_v22 }
 0x189   : > { %v558_v24 = vpack.c.bf16 %v531_v23, %v531_v23 }
 0x18b   : > { %575 = vst.msk [vmem:[%s1108_s22 + $0x20] sm:$0xf] %vm566_vm2, %v558_v24  ;;  %615 = vrot.lane.b32.xlu2 %v558_v24, %s1012_s24 }
 0x18e   : > { %v532_v25 = vpop.f32.mrf.mxu2 }
 0x18f   : > { %v533_v26 = vadd.f32 %v1099_v61, %v532_v25 }
 0x191   : > { %v559_v27 = vpack.c.bf16 %v533_v26, %v533_v26 }
 0x193   : > { %576 = vst.msk [vmem:[%s1108_s22 + $0x24] sm:$0xf] %vm566_vm2, %v559_v27  ;;  %617 = vrot.lane.b32.xlu1 %v559_v27, %s1012_s24  ;;  %679 = vrot.lane.b32.xlu2 %v558_v24, %s1011_s23 }
 0x196   : > { %v535_v28 = vpop.f32.mrf.mxu2 }
 0x197   : > { %v536_v29 = vadd.f32 %v1099_v61, %v535_v28 }
 0x199   : > { %v560_v30 = vpack.c.bf16 %v536_v29, %v536_v29 }
 0x19b   : > { %577 = vst.msk [vmem:[%s1108_s22 + $0x28] sm:$0xf] %vm566_vm2, %v560_v30  ;;  %681 = vrot.lane.b32.xlu1 %v559_v27, %s1011_s23  ;;  %619 = vrot.lane.b32.xlu2 %v560_v30, %s1012_s24 }
 0x19e   : > { %v537_v31 = vpop.f32.mrf.mxu2 }
 0x19f   : > { %v538_v32 = vadd.f32 %v1099_v61, %v537_v31  ;;  %v664_v33 = vpop.permute.xlu2 %663 }
 0x1a0   : > { %711 = vst.msk [vmem:[%s1168_s30] sm:$0xf] %vm566_vm2, %v664_v33 }
 0x1a1   : > { %v561_v34 = vpack.c.bf16 %v538_v32, %v538_v32 }
 0x1a3   : > { %578 = vst.msk [vmem:[%s1108_s22 + $0x2c] sm:$0xf] %vm566_vm2, %v561_v34  ;;  %621 = vrot.lane.b32.xlu1 %v561_v34, %s1012_s24  ;;  %683 = vrot.lane.b32.xlu2 %v560_v30, %s1011_s23 }
 0x1a6   : > { %v540_v35 = vpop.f32.mrf.mxu3 }
 0x1a7   : > { %v541_v36 = vadd.f32 %v1099_v61, %v540_v35 }
 0x1a9   : > { %v562_v37 = vpack.c.bf16 %v541_v36, %v541_v36 }
 0x1ab   : > { %579 = vst.msk [vmem:[%s1108_s22 + $0x30] sm:$0xf] %vm566_vm2, %v562_v37  ;;  %685 = vrot.lane.b32.xlu1 %v561_v34, %s1011_s23  ;;  %623 = vrot.lane.b32.xlu2 %v562_v37, %s1012_s24 }
 0x1ae   : > { %v542_v38 = vpop.f32.mrf.mxu3 }
 0x1af   : > { %v543_v39 = vadd.f32 %v1099_v61, %v542_v38  ;;  %v668_v40 = vpop.permute.xlu2 %667 }
 0x1b0   : > { %713 = vst.msk [vmem:[%s1168_s30 + $0x8] sm:$0xf] %vm566_vm2, %v668_v40 }
 0x1b1   : > { %v563_v41 = vpack.c.bf16 %v543_v39, %v543_v39 }
 0x1b3   : > { %580 = vst.msk [vmem:[%s1108_s22 + $0x34] sm:$0xf] %vm566_vm2, %v563_v41  ;;  %625 = vrot.lane.b32.xlu1 %v563_v41, %s1012_s24  ;;  %687 = vrot.lane.b32.xlu2 %v562_v37, %s1011_s23 }
 0x1b6   : > { %v545_v42 = vpop.f32.mrf.mxu3 }
 0x1b7   : > { %v546_v43 = vadd.f32 %v1099_v61, %v545_v42  ;;  %v606_v44 = vpop.permute.xlu2 %605  ;;  %v600_v45 = vpop.permute.xlu0 %599 }
 0x1b8   : > { %650 = vst.msk [vmem:[%s1193_s10 + $0xc] sm:$0xf] %vm566_vm2, %v606_v44 }
 0x1b9   : > { %v564_v46 = vpack.c.bf16 %v546_v43, %v546_v43  ;;  %647 = vst.msk [vmem:[%s1193_s10] sm:$0xf] %vm566_vm2, %v600_v45 }
 0x1bb   : > { %581 = vst.msk [vmem:[%s1108_s22 + $0x38] sm:$0xf] %vm566_vm2, %v564_v46  ;;  %689 = vrot.lane.b32.xlu1 %v563_v41, %s1011_s23  ;;  %627 = vrot.lane.b32.xlu2 %v564_v46, %s1012_s24 }
 0x1be   : > { %v547_v47 = vpop.f32.mrf.mxu3 }
 0x1bf   : > { %v548_v48 = vadd.f32 %v1099_v61, %v547_v47  ;;  %v602_v49 = vpop.permute.xlu1 %601  ;;  %v608_v50 = vpop.permute.xlu2 %607 }
 0x1c0   : > { %648 = vst.msk [vmem:[%s1193_s10 + $0x4] sm:$0xf] %vm566_vm2, %v602_v49 }
 0x1c1   : > { %v565_v51 = vpack.c.bf16 %v548_v48, %v548_v48  ;;  %651 = vst.msk [vmem:[%s1193_s10 + $0x10] sm:$0xf] %vm566_vm2, %v608_v50 }
 0x1c3   : > { %582 = vst.msk [vmem:[%s1108_s22 + $0x3c] sm:$0xf] %vm566_vm2, %v565_v51  ;;  %629 = vrot.lane.b32.xlu1 %v565_v51, %s1012_s24  ;;  %691 = vrot.lane.b32.xlu2 %v564_v46, %s1011_s23 }
 0x1c7   : > { %v666_v52 = vpop.permute.xlu1 %665  ;;  %v672_v53 = vpop.permute.xlu2 %671 }
 0x1c8   : > { %712 = vst.msk [vmem:[%s1168_s30 + $0x4] sm:$0xf] %vm566_vm2, %v666_v52 }
 0x1c9   : > { %715 = vst.msk [vmem:[%s1168_s30 + $0x10] sm:$0xf] %vm566_vm2, %v672_v53 }
 0x1cb   : > { %693 = vrot.lane.b32.xlu1 %v565_v51, %s1011_s23 }
 0x1cf   : > { %v604_v54 = vpop.permute.xlu1 %603  ;;  %v612_v55 = vpop.permute.xlu2 %611 }
 0x1d0   : > { %649 = vst.msk [vmem:[%s1193_s10 + $0x8] sm:$0xf] %vm566_vm2, %v604_v54 }
 0x1d1   : > { %653 = vst.msk [vmem:[%s1193_s10 + $0x18] sm:$0xf] %vm566_vm2, %v612_v55 }
 0x1d7   : > { %v670_v56 = vpop.permute.xlu1 %669  ;;  %v676_v57 = vpop.permute.xlu2 %675 }
 0x1d8   : > { %714 = vst.msk [vmem:[%s1168_s30 + $0xc] sm:$0xf] %vm566_vm2, %v670_v56 }
 0x1d9   : > { %717 = vst.msk [vmem:[%s1168_s30 + $0x18] sm:$0xf] %vm566_vm2, %v676_v57 }
 0x1df   : > { %v610_v58 = vpop.permute.xlu1 %609 }
 0x1e0   : > { %652 = vst.msk [vmem:[%s1193_s10 + $0x14] sm:$0xf] %vm566_vm2, %v610_v58 }
 0x1e5   : > { %v616_v59 = vpop.permute.xlu2 %615 }
 0x1e6   : > { %655 = vst.msk [vmem:[%s1193_s10 + $0x20] sm:$0xf] %vm566_vm2, %v616_v59 }
 0x1e7   : > { %v674_v60 = vpop.permute.xlu1 %673 }
 0x1e8   : > { %716 = vst.msk [vmem:[%s1168_s30 + $0x14] sm:$0xf] %vm566_vm2, %v674_v60 }
 0x1ed   : > { %v680_v61 = vpop.permute.xlu2 %679 }
 0x1ee   : > { %719 = vst.msk [vmem:[%s1168_s30 + $0x20] sm:$0xf] %vm566_vm2, %v680_v61 }
 0x1ef   : > { %v614_v62 = vpop.permute.xlu1 %613 }
 0x1f0   : > { %654 = vst.msk [vmem:[%s1193_s10 + $0x1c] sm:$0xf] %vm566_vm2, %v614_v62 }
 0x1f5   : > { %v620_v63 = vpop.permute.xlu2 %619 }
 0x1f6   : > { %657 = vst.msk [vmem:[%s1193_s10 + $0x28] sm:$0xf] %vm566_vm2, %v620_v63 }
 0x1f7   : > { %v678_v0 = vpop.permute.xlu1 %677 }
 0x1f8   : > { %718 = vst.msk [vmem:[%s1168_s30 + $0x1c] sm:$0xf] %vm566_vm2, %v678_v0 }
 0x1fd   : > { %v684_v1 = vpop.permute.xlu2 %683 }
 0x1fe   : > { %721 = vst.msk [vmem:[%s1168_s30 + $0x28] sm:$0xf] %vm566_vm2, %v684_v1 }
 0x205   : > { %v618_v2 = vpop.permute.xlu1 %617  ;;  %v624_v3 = vpop.permute.xlu2 %623 }
 0x206   : > { %656 = vst.msk [vmem:[%s1193_s10 + $0x24] sm:$0xf] %vm566_vm2, %v618_v2 }
 0x207   : > { %659 = vst.msk [vmem:[%s1193_s10 + $0x30] sm:$0xf] %vm566_vm2, %v624_v3 }
 0x20d   : > { %v682_v4 = vpop.permute.xlu1 %681  ;;  %v688_v5 = vpop.permute.xlu2 %687 }
 0x20e   : > { %720 = vst.msk [vmem:[%s1168_s30 + $0x24] sm:$0xf] %vm566_vm2, %v682_v4 }
 0x20f   : > { %723 = vst.msk [vmem:[%s1168_s30 + $0x30] sm:$0xf] %vm566_vm2, %v688_v5 }
 0x215   : > { %v622_v6 = vpop.permute.xlu1 %621  ;;  %v628_v7 = vpop.permute.xlu2 %627 }
 0x216   : > { %658 = vst.msk [vmem:[%s1193_s10 + $0x2c] sm:$0xf] %vm566_vm2, %v622_v6 }
 0x217   : > { %661 = vst.msk [vmem:[%s1193_s10 + $0x38] sm:$0xf] %vm566_vm2, %v628_v7 }
 0x21d   : > { %v686_v8 = vpop.permute.xlu1 %685  ;;  %v692_v9 = vpop.permute.xlu2 %691 }
 0x21e   : > { %722 = vst.msk [vmem:[%s1168_s30 + $0x2c] sm:$0xf] %vm566_vm2, %v686_v8 }
 0x21f   : > { %725 = vst.msk [vmem:[%s1168_s30 + $0x38] sm:$0xf] %vm566_vm2, %v692_v9 }
 0x225   : > { %v626_v10 = vpop.permute.xlu1 %625 }
 0x226   : > { %660 = vst.msk [vmem:[%s1193_s10 + $0x34] sm:$0xf] %vm566_vm2, %v626_v10 }
 0x22d   : > { %v690_v11 = vpop.permute.xlu1 %689 }
 0x22e   : > { %724 = vst.msk [vmem:[%s1168_s30 + $0x34] sm:$0xf] %vm566_vm2, %v690_v11 }
 0x235   : > { %v630_v12 = vpop.permute.xlu1 %629 }
 0x236   : > { %662 = vst.msk [vmem:[%s1193_s10 + $0x3c] sm:$0xf] %vm566_vm2, %v630_v12 }
 0x23d   : > { %v694_v13 = vpop.permute.xlu1 %693 }
 0x23e   : > { %726 = vst.msk [vmem:[%s1168_s30 + $0x3c] sm:$0xf] %vm566_vm2, %v694_v13 }
 0x23f PF: > { %s18_s26 = sadd.s32 1, %s1009_s26   ;;  %s1283_s24 = smov %s1005_s25 }
 0x240   : > { %p15_p5 = scmp.ge.s32.totalorder %s18_s26, 4   ;;  %s1284_s25 = smov %s1286_s27 }
 0x242   :  { %17 = sbr.rel (!%p15_p5) target bundleno = 2 (0x2), region = 100 }

// kernel: attn_blockpp.3
= control target key start
LH: loop header
LB: loop body
LE: loop exit
PB: predicated region body
PF: predicated region fallthrough
CT: control target
= control target key end

     0   :  { %s2310_s21 = smov 0   ;;  %s2312_s22 = smov 0   ;;  %s3025_s0 = inlined_call_operand.vmem [shape: f32[2,8,128], index: 0, kind: input, shape index: {}, may-alias: {0,6}]   ;;  %s3026_s1 = inlined_call_operand.vmem [shape: bf16[2,128,8], index: 1, kind: input, shape index: {}]   ;;  %s3027_s2 = inlined_call_operand.vmem [shape: bf16[2,128,8], index: 2, kind: input, shape index: {}]   ;;  %s3028_s3 = inlined_call_operand.vmem [shape: bf16[2,128,8], index: 3, kind: input, shape index: {}]   ;;  %s3029_s4 = inlined_call_operand.vmem [shape: bf16[8,8], index: 4, kind: input, shape index: {}]   ;;  %s3030_s5 = inlined_call_operand.vmem [shape: f32[1,8], index: 5, kind: input, shape index: {}]   ;;  %s3031_s6 = inlined_call_operand.vmem [shape: f32[2,8,128], index: 6, kind: output, shape index: {}, may-alias: {0,6}]  }
   0x1   :  { %s2314_s23 = smov 0  }
   0x2 LB: > { %s35_s24 = sadd.s32 1, %s2266_s22  ;;  %p1931_p0 = scmp.ge.s32.totalorder %s2270_s23, 1  ;;  %s2270_s23 = sphi %s2314_s23, %s16_s23   ;;  %s2266_s22 = sphi %s2312_s22, %s3043_s22   ;;  %s2262_s21 = sphi %s2310_s21, %s3042_s21  }
   0x3   : > { %p37_p1 = scmp.ge.s32.totalorder %s35_s24, 2  ;;  %p288_p2 = scmp.lt.s32.totalorder %s2270_s23, 3 }
   0x5   : > { %s3045_s24 = smov (%p37_p1, %s35_s24), 0  ;;  %p289_p3 = pnand %p1931_p0, %p288_p2 }
   0x6   : > { %p349_p4 = scmp.lt.s32.totalorder (!%p289_p3), %s2262_s21, 1 }
   0x7   : > { %292 = sbr.rel (%p289_p3) target bundleno = 1182 (0x49e), region = 44 }
   0xc   : > { %s3047_s21 = smov (!%p349_p4, %s2262_s21), 1  ;;  %vm431_vm0 = vcmask 64512   ;;  %v675_v24 = vlaneseq  ;;  %vm398_vm2 = vcmask 7168   ;;  %v2272_v44 = vmov -1e+30  }
   0xd   : > { %s2331_s25 = sshll.u32 %s3047_s21, 6  ;;  %399 = vst.msk [vmem:[#allocation2] sm:$0xff] %vm398_vm2, %v2272_v44  ;;  %v2273_v58 = vmov 0   ;;  %v2274_v59 = vmov 0.0   ;;  %s1932_s15 = sshll.u32 %s3047_s21, 3 }
   0xe   : > { %s374_s28 = scalar_lea.vmem %s3027_s2, %s2331_s25  ;;  %s364_s7 = scalar_lea.vmem %s3026_s1, %s2331_s25  ;;  %v2357_v25 = vand.u32 127, %v675_v24  ;;  %400 = vst.msk [vmem:[#allocation2 + $0x8] sm:$0xff] %vm398_vm2, %v2272_v44  ;;  %2148 = vset.pattern.permute.xlu0 %v2273_v58  ;;  %2149 = vset.pattern.permute.xlu1 %v2273_v58 }
   0xf   : > { %v2096_v0 = vld [vmem:[%s374_s28 + $0x38] sm:$0xff]  ;;  %v2095_v2 = vld [vmem:[%s374_s28 + $0x30] sm:$0xff]  ;;  %v2094_v4 = vld [vmem:[%s374_s28 + $0x28] sm:$0xff]  ;;  %401 = vst.msk [vmem:[#allocation2 + $0x10] sm:$0xff] %vm398_vm2, %v2272_v44  ;;  %2150 = vset.pattern.permute.xlu2 %v2273_v58  ;;  %s2609_s10 = scalar_lea.vmem %s3028_s3, %s2331_s25  ;;  %s355_s18 = scalar_lea.vmem %s3025_s0, %s1932_s15 }
  0x10   : > { %v624_v1 = vsel %vm431_vm0, %v2096_v0, 0  ;;  %v621_v3 = vsel %vm431_vm0, %v2095_v2, 0  ;;  %v618_v5 = vsel %vm431_vm0, %v2094_v4, 0  ;;  %v2093_v6 = vld [vmem:[%s374_s28 + $0x20] sm:$0xff]  ;;  %v2092_v8 = vld [vmem:[%s374_s28 + $0x18] sm:$0xff]  ;;  %v2091_v10 = vld [vmem:[%s374_s28 + $0x10] sm:$0xff]  ;;  %s392_s25 = scalar_lea.vmem %s3031_s6, %s1932_s15 }
  0x11   : > { %626 = vmatpush.bf16.xpose.msra.mxu0 %v624_v1  ;;  %2105 = vmatpush.bf16.xpose.msra.mxu3 %v624_v1  ;;  %v615_v7 = vsel %vm431_vm0, %v2093_v6, 0  ;;  %v612_v9 = vsel %vm431_vm0, %v2092_v8, 0  ;;  %v609_v11 = vsel %vm431_vm0, %v2091_v10, 0  ;;  %v2090_v12 = vld [vmem:[%s374_s28 + $0x8] sm:$0xff]  ;;  %v2089_v14 = vld [vmem:[%s374_s28] sm:$0xff]  ;;  %v2087_v19 = vld [vmem:[%s364_s7 + $0x30] sm:$0xff] }
  0x12   : > { %v606_v13 = vsel %vm431_vm0, %v2090_v12, 0  ;;  %v603_v15 = vsel %vm431_vm0, %v2089_v14, 0  ;;  %v2081_v16 = vld [vmem:[%s364_s7] sm:$0xff]  ;;  %v2086_v17 = vld [vmem:[%s364_s7 + $0x28] sm:$0xff]  ;;  %v2083_v20 = vld [vmem:[%s364_s7 + $0x10] sm:$0xff]  ;;  %vm679_vm1 = vcmp.lt.s32.totalorder %v2357_v25, 64 }
  0x13   : > { %v2082_v18 = vld [vmem:[%s364_s7 + $0x8] sm:$0xff]  ;;  %v2088_v21 = vld [vmem:[%s364_s7 + $0x38] sm:$0xff]  ;;  %v2085_v23 = vld [vmem:[%s364_s7 + $0x20] sm:$0xff]  ;;  %402 = vst.msk [vmem:[#allocation2 + $0x18] sm:$0xff] %vm398_vm2, %v2272_v44 }
  0x14   : > { %v2084_v22 = vld [vmem:[%s364_s7 + $0x18] sm:$0xff]  ;;  %403 = vst.msk [vmem:[#allocation2 + $0x20] sm:$0xff] %vm398_vm2, %v2272_v44  ;;  %v698_v60 = vld [vmem:[#allocation2] sm:$0xff]  ;;  %vm2647_vm3 = vmpackc.low %vm679_vm1, %vm679_vm1 }
  0x15   : > { %404 = vst.msk [vmem:[#allocation2 + $0x28] sm:$0xff] %vm398_vm2, %v2272_v44  ;;  %v2486_v1 = vld [vmem:[#allocation2 + $0x8] sm:$0xff] }
  0x16   : > { %405 = vst.msk [vmem:[#allocation2 + $0x30] sm:$0xff] %vm398_vm2, %v2272_v44  ;;  %v2518_v14 = vld [vmem:[#allocation2 + $0x10] sm:$0xff] }
  0x17   : > { %406 = vst.msk [vmem:[#allocation2 + $0x38] sm:$0xff] %vm398_vm2, %v2272_v44 }
  0x18   : > { %407 = vst.msk [vmem:[#allocation2 + $0x40] sm:$0xff] %vm398_vm2, %v2272_v44 }
  0x19   : > { %627 = vmatpush.bf16.xpose.msra.mxu0 %v621_v3  ;;  %2106 = vmatpush.bf16.xpose.msra.mxu3 %v621_v3  ;;  %408 = vst.msk [vmem:[#allocation2 + $0x48] sm:$0xff] %vm398_vm2, %v2272_v44 }
  0x1a   : > { %409 = vst.msk [vmem:[#allocation2 + $0x50] sm:$0xff] %vm398_vm2, %v2272_v44 }
  0x1b   : > { %410 = vst.msk [vmem:[#allocation2 + $0x58] sm:$0xff] %vm398_vm2, %v2272_v44  ;;  %v2538_v24 = vld [vmem:[#allocation2 + $0x20] sm:$0xff] }
  0x1c   : > { %411 = vst.msk [vmem:[#allocation2 + $0x60] sm:$0xff] %vm398_vm2, %v2272_v44 }
  0x1d   : > { %412 = vst.msk [vmem:[#allocation2 + $0x68] sm:$0xff] %vm398_vm2, %v2272_v44 }
  0x1e   : > { %413 = vst.msk [vmem:[#allocation2 + $0x70] sm:$0xff] %vm398_vm2, %v2272_v44 }
  0x1f   : > { %414 = vst.msk [vmem:[#allocation2 + $0x78] sm:$0xff] %vm398_vm2, %v2272_v44 }
  0x20   : > { %432 = vst.msk [vmem:[#allocation4] sm:$0xff] %vm431_vm0, %v2274_v59 }
  0x21   : > { %628 = vmatpush.bf16.xpose.msra.mxu0 %v618_v5  ;;  %2107 = vmatpush.bf16.xpose.msra.mxu3 %v618_v5  ;;  %415 = vst.msk [vmem:[#allocation3] sm:$0xff] %vm398_vm2, %v2274_v59  ;;  %v2482_v0 = vld [vmem:[#allocation2 + $0x50] sm:$0xff] }
  0x22   : > { %416 = vst.msk [vmem:[#allocation3 + $0x8] sm:$0xff] %vm398_vm2, %v2274_v59 }
  0x23   : > { %417 = vst.msk [vmem:[#allocation3 + $0x10] sm:$0xff] %vm398_vm2, %v2274_v59 }
  0x24   : > { %418 = vst.msk [vmem:[#allocation3 + $0x18] sm:$0xff] %vm398_vm2, %v2274_v59 }
  0x25   : > { %419 = vst.msk [vmem:[#allocation3 + $0x20] sm:$0xff] %vm398_vm2, %v2274_v59 }
  0x26   : > { %420 = vst.msk [vmem:[#allocation3 + $0x28] sm:$0xff] %vm398_vm2, %v2274_v59 }
  0x27   : > { %421 = vst.msk [vmem:[#allocation3 + $0x30] sm:$0xff] %vm398_vm2, %v2274_v59 }
  0x28   : > { %422 = vst.msk [vmem:[#allocation3 + $0x38] sm:$0xff] %vm398_vm2, %v2274_v59 }
  0x29   : > { %629 = vmatpush.bf16.xpose.msra.mxu0 %v615_v7  ;;  %2108 = vmatpush.bf16.xpose.msra.mxu3 %v615_v7  ;;  %423 = vst.msk [vmem:[#allocation3 + $0x40] sm:$0xff] %vm398_vm2, %v2274_v59 }
  0x2a   : > { %424 = vst.msk [vmem:[#allocation3 + $0x48] sm:$0xff] %vm398_vm2, %v2274_v59 }
  0x2b   : > { %425 = vst.msk [vmem:[#allocation3 + $0x50] sm:$0xff] %vm398_vm2, %v2274_v59 }
  0x2c   : > { %426 = vst.msk [vmem:[#allocation3 + $0x58] sm:$0xff] %vm398_vm2, %v2274_v59 }
  0x2d   : > { %427 = vst.msk [vmem:[#allocation3 + $0x60] sm:$0xff] %vm398_vm2, %v2274_v59 }
  0x2e   : > { %428 = vst.msk [vmem:[#allocation3 + $0x68] sm:$0xff] %vm398_vm2, %v2274_v59 }
  0x2f   : > { %429 = vst.msk [vmem:[#allocation3 + $0x70] sm:$0xff] %vm398_vm2, %v2274_v59 }
  0x30   : > { %430 = vst.msk [vmem:[#allocation3 + $0x78] sm:$0xff] %vm398_vm2, %v2274_v59 }
  0x31   : > { %630 = vmatpush.bf16.xpose.msra.mxu0 %v612_v9  ;;  %2109 = vmatpush.bf16.xpose.msra.mxu3 %v612_v9  ;;  %433 = vst.msk [vmem:[#allocation4 + $0x8] sm:$0xff] %vm431_vm0, %v2274_v59  ;;  %v2505_v9 = vld [vmem:[#allocation2 + $0x58] sm:$0xff] }
  0x32   : > { %434 = vst.msk [vmem:[#allocation4 + $0x10] sm:$0xff] %vm431_vm0, %v2274_v59 }
  0x33   : > { %435 = vst.msk [vmem:[#allocation4 + $0x18] sm:$0xff] %vm431_vm0, %v2274_v59 }
  0x34   : > { %436 = vst.msk [vmem:[#allocation4 + $0x20] sm:$0xff] %vm431_vm0, %v2274_v59 }
  0x35   : > { %437 = vst.msk [vmem:[#allocation4 + $0x28] sm:$0xff] %vm431_vm0, %v2274_v59 }
  0x36   : > { %438 = vst.msk [vmem:[#allocation4 + $0x30] sm:$0xff] %vm431_vm0, %v2274_v59 }
  0x37   : > { %439 = vst.msk [vmem:[#allocation4 + $0x38] sm:$0xff] %vm431_vm0, %v2274_v59 }
  0x38   : > { %440 = vst.msk [vmem:[#allocation4 + $0x40] sm:$0xff] %vm431_vm0, %v2274_v59 }
  0x39   : > { %631 = vmatpush.bf16.xpose.msra.mxu0 %v609_v11  ;;  %2110 = vmatpush.bf16.xpose.msra.mxu3 %v609_v11  ;;  %441 = vst.msk [vmem:[#allocation4 + $0x48] sm:$0xff] %vm431_vm0, %v2274_v59 }
  0x3a   : > { %442 = vst.msk [vmem:[#allocation4 + $0x50] sm:$0xff] %vm431_vm0, %v2274_v59 }
  0x3b   : > { %443 = vst.msk [vmem:[#allocation4 + $0x58] sm:$0xff] %vm431_vm0, %v2274_v59 }
  0x3c   : > { %444 = vst.msk [vmem:[#allocation4 + $0x60] sm:$0xff] %vm431_vm0, %v2274_v59 }
  0x3d   : > { %445 = vst.msk [vmem:[#allocation4 + $0x68] sm:$0xff] %vm431_vm0, %v2274_v59 }
  0x3e   : > { %446 = vst.msk [vmem:[#allocation4 + $0x70] sm:$0xff] %vm431_vm0, %v2274_v59 }
  0x3f   : > { %447 = vst.msk [vmem:[#allocation4 + $0x78] sm:$0xff] %vm431_vm0, %v2274_v59 }
  0x41   : > { %632 = vmatpush.bf16.xpose.msra.mxu0 %v606_v13  ;;  %2111 = vmatpush.bf16.xpose.msra.mxu3 %v606_v13 }
  0x49   : > { %633 = vmatpush.bf16.xpose.msra.mxu0 %v603_v15  ;;  %2112 = vmatpush.bf16.xpose.msra.mxu3 %v603_v15  ;;  %v2520_v15 = vld [vmem:[#allocation2 + $0x60] sm:$0xff] }
  0x50   : > { %2004 = vmatmul.msk.bf16.vlgmr.msra.gmra.mxu0 %vm431_vm0, %v2081_v16  ;;  %2009 = vmatmul.msk.bf16.vlgmr.msra.gmra.mxu3 %vm431_vm0, %v2086_v17 }
  0x60   : > { %2005 = vmatmul.msk.bf16.gmra.mxu0 %vm431_vm0, %v2082_v18  ;;  %2010 = vmatmul.msk.bf16.gmra.mxu3 %vm431_vm0, %v2087_v19 }
  0x70   : > { %2006 = vmatmul.msk.bf16.gmra.mxu0 %vm431_vm0, %v2083_v20  ;;  %2011 = vmatmul.msk.bf16.gmra.mxu3 %vm431_vm0, %v2088_v21  ;;  %v2662_v21 = vld [vmem:[#allocation2 + $0x68] sm:$0xff] }
  0x80   : > { %2007 = vmatmul.msk.bf16.gmra.mxu0 %vm431_vm0, %v2084_v22  ;;  %v701_v22 = vld [vmem:[#allocation2 + $0x18] sm:$0xff] }
  0x90   : > { %2008 = vmatmul.msk.bf16.gmra.mxu0 %vm431_vm0, %v2085_v23 }
  0xcd   : > { %v635_v26 = vpop.f32.mrf.mxu0 }
  0xce   : > { %v2362_v27 = vsel %vm679_vm1, %v635_v26, -1e+30 }
  0xcf   : > { %714 = vmax.xlane.f32.xlu0 %v2362_v27 }
  0xd3   : > { %v660_v28 = vpop.f32.mrf.mxu3 }
  0xd4   : > { %v2367_v29 = vsel %vm679_vm1, %v660_v28, -1e+30 }
  0xd5   : > { %v637_v30 = vpop.f32.mrf.mxu0  ;;  %734 = vmax.xlane.f32.xlu2 %v2367_v29 }
  0xd6   : > { %v2372_v31 = vsel %vm679_vm1, %v637_v30, -1e+30 }
  0xd7   : > { %716 = vmax.xlane.f32.xlu0 %v2372_v31 }
  0xdb   : > { %v662_v32 = vpop.f32.mrf.mxu3 }
  0xdc   : > { %v2377_v33 = vsel %vm679_vm1, %v662_v32, -1e+30 }
  0xdd   : > { %736 = vmax.xlane.f32.xlu1 %v2377_v33  ;;  %v640_v34 = vpop.f32.mrf.mxu0 }
  0xde   : > { %v2382_v35 = vsel %vm679_vm1, %v640_v34, -1e+30 }
  0xe3   : > { %v665_v36 = vpop.f32.mrf.mxu3 }
  0xe4   : > { %v2386_v37 = vsel %vm679_vm1, %v665_v36, -1e+30 }
  0xe5   : > { %718 = vmax.xlane.f32.xlu1 %v2382_v35  ;;  %v642_v38 = vpop.f32.mrf.mxu0  ;;  %738 = vmax.xlane.f32.xlu2 %v2386_v37 }
  0xe6   : > { %v2392_v39 = vsel %vm679_vm1, %v642_v38, -1e+30  ;;  %v2549_v38 = vld [vmem:[#allocation2 + $0x28] sm:$0xff] }
  0xeb   : > { %v2410_v46 = vpop.f32.mrf.mxu3 }
  0xed   : > { %v645_v40 = vpop.f32.mrf.mxu0  ;;  %720 = vmax.xlane.f32.xlu1 %v2392_v39 }
  0xee   : > { %v2397_v41 = vsel %vm679_vm1, %v645_v40, -1e+30 }
  0xef   : > { %722 = vmax.xlane.f32.xlu2 %v2397_v41 }
  0xf3   : > { %v670_v50 = vpop.f32.mrf.mxu3 }
  0xf4   : > { %v2435_v51 = vsel %vm679_vm1, %v670_v50, -1e+30  ;;  %v2568_v50 = vld [vmem:[#allocation2 + $0x30] sm:$0xff] }
  0xf5   : > { %v647_v42 = vpop.f32.mrf.mxu0 }
  0xf6   : > { %v2402_v43 = vsel %vm679_vm1, %v647_v42, -1e+30 }
  0xf7   : > { %724 = vmax.xlane.f32.xlu2 %v2402_v43 }
  0xfb   : > { %v672_v54 = vpop.f32.mrf.mxu3 }
  0xfc   : > { %v2445_v55 = vsel %vm679_vm1, %v672_v54, -1e+30 }
  0xfd   : > { %v650_v45 = vpop.f32.mrf.mxu0 }
  0xfe   : > { %v2415_v47 = vsel %vm679_vm1, %v650_v45, -1e+30 }
  0xff   : > { %726 = vmax.xlane.f32.xlu2 %v2415_v47 }
 0x105   : > { %v652_v48 = vpop.f32.mrf.mxu0 }
 0x106   : > { %v2428_v49 = vsel %vm679_vm1, %v652_v48, -1e+30  ;;  %v2564_v48 = vsel %vm679_vm1, %v2410_v46, -1e+30 }
 0x107   : > { %728 = vmax.xlane.f32.xlu2 %v2428_v49 }
 0x10d   : > { %v655_v52 = vpop.f32.mrf.mxu0 }
 0x10e   : > { %v2439_v53 = vsel %vm679_vm1, %v655_v52, -1e+30 }
 0x10f   : > { %730 = vmax.xlane.f32.xlu1 %v2439_v53  ;;  %742 = vmax.xlane.f32.xlu2 %v2435_v51 }
 0x115   : > { %v657_v56 = vpop.f32.mrf.mxu0 }
 0x116   : > { %v2449_v57 = vsel %vm679_vm1, %v657_v56, -1e+30  ;;  %v2575_v56 = vld [vmem:[#allocation2 + $0x38] sm:$0xff] }
 0x117   : > { %732 = vmax.xlane.f32.xlu0 %v2449_v57  ;;  %744 = vmax.xlane.f32.xlu1 %v2445_v55 }
 0x142   : > { %v715_v61 = vpop.xlane.xlu0 %714 }
 0x143   : > { %v746_v62 = vmax.f32 %v698_v60, %v715_v61  ;;  %v2587_v61 = vld [vmem:[#allocation2 + $0x70] sm:$0xff] }
 0x145   : > { %1300 = vst.msk [vmem:[#allocation2] sm:$0xff] %vm398_vm2, %v746_v62  ;;  %812 = vperm.xlu0 %2148, %v746_v62   ;;  %v762_v63 = vsub.f32 %v698_v60, %v746_v62  ;;  %v2585_v60 = vld [vmem:[#allocation2 + $0x40] sm:$0xff] }
 0x147   : > { %v778_v4 = vmul.f32 1.442695, %v762_v63 }
 0x148   : > { %v735_v2 = vpop.xlane.xlu2 %734 }
 0x149   : > { %v2490_v3 = vmax.f32 %v2482_v0, %v735_v2  ;;  %2152 = vpow2.f32 %v778_v4 }
 0x14a   : > { %v717_v5 = vpop.xlane.xlu0 %716 }
 0x14b   : > { %v2494_v6 = vmax.f32 %v2486_v1, %v717_v5  ;;  %v772_v7 = vsub.f32 %v2482_v0, %v2490_v3  ;;  %1310 = vst.msk [vmem:[#allocation2 + $0x50] sm:$0xff] %vm398_vm2, %v2490_v3 }
 0x14d   : > { %v763_v8 = vsub.f32 %v2486_v1, %v2494_v6  ;;  %1301 = vst.msk [vmem:[#allocation2 + $0x8] sm:$0xff] %vm398_vm2, %v2494_v6  ;;  %817 = vperm.xlu1 %2149, %v2494_v6  }
 0x14f   : > { %v2515_v13 = vpop.eup %2152  ;;  %v780_v0 = vmul.f32 1.442695, %v763_v8 }
 0x150   : > { %v737_v10 = vpop.xlane.xlu1 %736 }
 0x151   : > { %v2508_v11 = vmax.f32 %v2505_v9, %v737_v10  ;;  %v2603_v10 = vld [vmem:[#allocation2 + $0x48] sm:$0xff] }
 0x153   : > { %1311 = vst.msk [vmem:[#allocation2 + $0x58] sm:$0xff] %vm398_vm2, %v2508_v11  ;;  %867 = vperm.xlu2 %2150, %v2508_v11  }
 0x155   : > { %1069 = vperm.xlu1 %2149, %v2515_v13  }
 0x158   : > { %v719_v16 = vpop.xlane.xlu1 %718  ;;  %v739_v17 = vpop.xlane.xlu2 %738 }
 0x159   : > { %v2523_v18 = vmax.f32 %v2518_v14, %v719_v16  ;;  %v2526_v19 = vmax.f32 %v2520_v15, %v739_v17 }
 0x15b   : > { %v764_v20 = vsub.f32 %v2518_v14, %v2523_v18  ;;  %1302 = vst.msk [vmem:[#allocation2 + $0x10] sm:$0xff] %vm398_vm2, %v2523_v18  ;;  %822 = vperm.xlu2 %2150, %v2523_v18   ;;  %v964_v18 = vld [vmem:[#allocation3 + $0x50] sm:$0xff]  ;;  %v3034_v8 = vsub.f32 %v2520_v15, %v2526_v19 }
 0x15c   : > { %1312 = vst.msk [vmem:[#allocation2 + $0x60] sm:$0xff] %vm398_vm2, %v2526_v19 }
 0x15d   : > { %872 = vperm.xlu1 %2149, %v2526_v19  }
 0x160   : > { %v721_v23 = vpop.xlane.xlu1 %720 }
 0x161   : > { %v749_v26 = vmax.f32 %v701_v22, %v721_v23 }
 0x162   : > { %v723_v28 = vpop.xlane.xlu2 %722 }
 0x163   : > { %v765_v30 = vsub.f32 %v701_v22, %v749_v26  ;;  %1303 = vst.msk [vmem:[#allocation2 + $0x18] sm:$0xff] %vm398_vm2, %v749_v26  ;;  %v2542_v32 = vmax.f32 %v2538_v24, %v723_v28  ;;  %v2104_v22 = vld [vmem:[%s2609_s10 + $0x38] sm:$0xff]  ;;  %v2102_v28 = vld [vmem:[%s2609_s10 + $0x28] sm:$0xff] }
 0x164   : > { %1219 = vmatpush.bf16.msra.mxu1 %v2104_v22  ;;  %2113 = vmatpush.bf16.msrb.mxu3 %v2104_v22 }
 0x165   : > { %v784_v34 = vmul.f32 1.442695, %v765_v30  ;;  %v766_v36 = vsub.f32 %v2538_v24, %v2542_v32  ;;  %1304 = vst.msk [vmem:[#allocation2 + $0x20] sm:$0xff] %vm398_vm2, %v2542_v32  ;;  %832 = vperm.xlu2 %2150, %v2542_v32   ;;  %827 = vperm.xlu1 %2149, %v749_v26   ;;  %v2103_v26 = vld [vmem:[%s2609_s10 + $0x30] sm:$0xff]  ;;  %v2101_v30 = vld [vmem:[%s2609_s10 + $0x20] sm:$0xff] }
 0x167   : > { %2154 = vpow2.f32 %v784_v34  ;;  %v2623_v34 = vld [vmem:[#allocation2 + $0x78] sm:$0xff] }
 0x168   : > { %1220 = vmatpush.bf16.msra.mxu1 %v2103_v26  ;;  %2114 = vmatpush.bf16.msrb.mxu3 %v2103_v26 }
 0x16a   : > { %v725_v40 = vpop.xlane.xlu2 %724 }
 0x16b   : > { %v2552_v42 = vmax.f32 %v2549_v38, %v725_v40 }
 0x16c   : > { %1221 = vmatpush.bf16.msra.mxu1 %v2102_v28  ;;  %2115 = vmatpush.bf16.msrb.mxu3 %v2102_v28 }
 0x16d   : > { %v2554_v44 = vpop.eup %2154  ;;  %1305 = vst.msk [vmem:[#allocation2 + $0x28] sm:$0xff] %vm398_vm2, %v2552_v42  ;;  %837 = vperm.xlu2 %2150, %v2552_v42  }
 0x16e   : > { %1084 = vperm.xlu1 %2149, %v2554_v44  }
 0x16f   : > { %740 = vmax.xlane.f32.xlu0 %v2564_v48 }
 0x170   : > { %1222 = vmatpush.bf16.msra.mxu1 %v2101_v30  ;;  %2116 = vmatpush.bf16.msrb.mxu3 %v2101_v30 }
 0x172   : > { %v727_v52 = vpop.xlane.xlu2 %726 }
 0x173   : > { %v2571_v54 = vmax.f32 %v2568_v50, %v727_v52 }
 0x175   : > { %1306 = vst.msk [vmem:[#allocation2 + $0x30] sm:$0xff] %vm398_vm2, %v2571_v54 }
 0x17a   : > { %v729_v58 = vpop.xlane.xlu2 %728 }
 0x17b   : > { %v2578_v59 = vmax.f32 %v2575_v56, %v729_v58  ;;  %v2100_v58 = vld [vmem:[%s2609_s10 + $0x18] sm:$0xff] }
 0x17c   : > { %1223 = vmatpush.bf16.msra.mxu1 %v2100_v58  ;;  %2117 = vmatpush.bf16.msrb.mxu3 %v2100_v58 }
 0x17d   : > { %1307 = vst.msk [vmem:[#allocation2 + $0x38] sm:$0xff] %vm398_vm2, %v2578_v59  ;;  %847 = vperm.xlu1 %2149, %v2578_v59  }
 0x182   : > { %v731_v62 = vpop.xlane.xlu1 %730  ;;  %v743_v63 = vpop.xlane.xlu2 %742 }
 0x183   : > { %v2590_v2 = vmax.f32 %v2585_v60, %v731_v62  ;;  %862 = vperm.xlu0 %2148, %v2490_v3   ;;  %v2594_v4 = vmax.f32 %v2587_v61, %v743_v63  ;;  %v2099_v62 = vld [vmem:[%s2609_s10 + $0x10] sm:$0xff]  ;;  %v2098_v63 = vld [vmem:[%s2609_s10 + $0x8] sm:$0xff] }
 0x184   : > { %1224 = vmatpush.bf16.msra.mxu1 %v2099_v62  ;;  %2118 = vmatpush.bf16.msrb.mxu3 %v2099_v62 }
 0x185   : > { %1308 = vst.msk [vmem:[#allocation2 + $0x40] sm:$0xff] %vm398_vm2, %v2590_v2  ;;  %852 = vperm.xlu2 %2150, %v2590_v2  }
 0x186   : > { %1314 = vst.msk [vmem:[#allocation2 + $0x70] sm:$0xff] %vm398_vm2, %v2594_v4 }
 0x188   : > { %1225 = vmatpush.bf16.msra.mxu1 %v2098_v63  ;;  %2119 = vmatpush.bf16.msrb.mxu3 %v2098_v63 }
 0x18a   : > { %v733_v16 = vpop.xlane.xlu0 %732  ;;  %v745_v40 = vpop.xlane.xlu1 %744 }
 0x18b   : > { %v2612_v17 = vmax.f32 %v2603_v10, %v733_v16  ;;  %v2626_v52 = vmax.f32 %v2623_v34, %v745_v40  ;;  %v2097_v16 = vld [vmem:[%s2609_s10] sm:$0xff] }
 0x18c   : > { %1226 = vmatpush.bf16.msra.mxu1 %v2097_v16  ;;  %2120 = vmatpush.bf16.msrb.mxu3 %v2097_v16 }
 0x18d   : > { %1309 = vst.msk [vmem:[#allocation2 + $0x48] sm:$0xff] %vm398_vm2, %v2612_v17  ;;  %857 = vperm.xlu2 %2150, %v2612_v17  }
 0x18e   : > { %1315 = vst.msk [vmem:[#allocation2 + $0x78] sm:$0xff] %vm398_vm2, %v2626_v52 }
 0x1ad   : > { %v2635_v30 = vpop.permute.xlu2 %867 }
 0x1b5   : > { %v823_v63 = vpop.permute.xlu2 %822 }
 0x1b7   : > { %v813_v22 = vpop.permute.xlu0 %812 }
 0x1b8   : > { %v890_v26 = vsub.f32 %v2362_v27, %v813_v22 }
 0x1ba   : > { %v906_v28 = vmul.f32 1.442695, %v890_v26  ;;  %v892_v26 = vsub.f32 %v2382_v35, %v823_v63 }
 0x1bc   : > { %2156 = vpow2.f32 %v906_v28  ;;  %v910_v28 = vmul.f32 1.442695, %v892_v26 }
 0x1bf   : > { %v818_v40 = vpop.permute.xlu1 %817 }
 0x1c0   : > { %v891_v46 = vsub.f32 %v2372_v31, %v818_v40 }
 0x1c2   : > { %v2157_v58 = vpop.eup %2156  ;;  %v908_v23 = vmul.f32 1.442695, %v891_v46  ;;  %v833_v46 = vpop.permute.xlu2 %832 }
 0x1c3   : > { %v938_v62 = vsel %vm679_vm1, %v2157_v58, 0.0  ;;  %v894_v32 = vsub.f32 %v2397_v41, %v833_v46 }
 0x1c4   : > { %986 = vadd.xlane.f32.xlu1 %v938_v62  ;;  %2158 = vpow2.f32 %v908_v23  ;;  %v786_v23 = vmul.f32 1.442695, %v766_v36 }
 0x1c5   : > { %v914_v26 = vmul.f32 1.442695, %v894_v32 }
 0x1c6   : > { %2160 = vpow2.f32 %v786_v23 }
 0x1c7   : > { %v2640_v5 = vpop.permute.xlu1 %1069  ;;  %2162 = vpow2.f32 %v910_v28 }
 0x1ca   : > { %v2642_v16 = vpop.eup %2158  ;;  %v838_v40 = vpop.permute.xlu2 %837 }
 0x1cb   : > { %v2045_v31 = vpack.c.bf16 %v2642_v16, %v2157_v58  ;;  %v895_v36 = vsub.f32 %v2402_v43, %v838_v40 }
 0x1cc   : > { %v2659_v58 = vpop.eup %2160 }
 0x1cd   : > { %2046 = vmatmul.msk.bf16.vlgmr.msra.gmra.mxu1 %vm2647_vm3, %v2045_v31  ;;  %v2163_v24 = vpop.eup %2162  ;;  %v916_v41 = vmul.f32 1.442695, %v895_v36 }
 0x1cf   : > { %v873_v22 = vpop.permute.xlu1 %872 }
 0x1d7   : > { %v828_v62 = vpop.permute.xlu1 %827 }
 0x1d8   : > { %v893_v12 = vsub.f32 %v2392_v39, %v828_v62 }
 0x1da   : > { %v912_v45 = vmul.f32 1.442695, %v893_v12 }
 0x1dc   : > { %2164 = vpow2.f32 %v912_v45 }
 0x1dd   : > { %1089 = vperm.xlu1 %2149, %v2659_v58   ;;  %2166 = vpow2.f32 %v914_v26  ;;  %v902_v26 = vsub.f32 %v2386_v37, %v873_v22 }
 0x1de   : > { %2168 = vpow2.f32 %v916_v41 }
 0x1df   : > { %v853_v31 = vpop.permute.xlu2 %852 }
 0x1e0   : > { %v898_v23 = vsub.f32 %v2439_v53, %v853_v31 }
 0x1e2   : > { %v2165_v35 = vpop.eup %2164  ;;  %v741_v63 = vpop.xlane.xlu0 %740  ;;  %v922_v43 = vmul.f32 1.442695, %v898_v23 }
 0x1e3   : > { %v2668_v39 = vmax.f32 %v2662_v21, %v741_v63  ;;  %v2048_v12 = vpack.c.bf16 %v2165_v35, %v2163_v24  ;;  %v2167_v40 = vpop.eup %2166 }
 0x1e4   : > { %2170 = vpow2.f32 %v922_v43  ;;  %v2169_v62 = vpop.eup %2168  ;;  %v930_v43 = vmul.f32 1.442695, %v902_v26 }
 0x1e5   : > { %v775_v45 = vsub.f32 %v2662_v21, %v2668_v39  ;;  %1313 = vst.msk [vmem:[#allocation2 + $0x68] sm:$0xff] %vm398_vm2, %v2668_v39  ;;  %2049 = vmatmul.msk.bf16.gmra.mxu1 %vm2647_vm3, %v2048_v12  ;;  %877 = vperm.xlu0 %2148, %v2668_v39   ;;  %v2051_v63 = vpack.c.bf16 %v2169_v62, %v2167_v40 }
 0x1e6   : > { %v776_v21 = vsub.f32 %v2587_v61, %v2594_v4 }
 0x1e7   : > { %v858_v46 = vpop.permute.xlu2 %857  ;;  %v804_v25 = vmul.f32 1.442695, %v775_v45 }
 0x1e8   : > { %v899_v53 = vsub.f32 %v2449_v57, %v858_v46 }
 0x1ea   : > { %v924_v28 = vmul.f32 1.442695, %v899_v53  ;;  %v2679_v31 = vpop.eup %2170  ;;  %v940_v53 = vsel %vm679_vm1, %v2163_v24, 0.0  ;;  %v901_v24 = vsub.f32 %v2377_v33, %v2635_v30  ;;  %v954_v33 = vld [vmem:[#allocation3] sm:$0xff] }
 0x1eb   : > { %v970_v30 = vmul.f32 %v2515_v13, %v954_v33 }
 0x1ec   : > { %2172 = vpow2.f32 %v924_v28  ;;  %v942_v28 = vsel %vm679_vm1, %v2167_v40, 0.0  ;;  %v941_v40 = vsel %vm679_vm1, %v2165_v35, 0.0 }
 0x1ed   : > { %882 = vperm.xlu0 %2148, %v2594_v4   ;;  %v1679_v4 = vld [vmem:[%s3029_s4] sm:$0xf] }
 0x1f2   : > { %v2681_v32 = vpop.eup %2172 }
 0x1f3   : > { %v2057_v36 = vpack.c.bf16 %v2681_v32, %v2679_v31 }
 0x1f5   : > { %2052 = vmatmul.msk.bf16.gmra.mxu1 %vm2647_vm3, %v2051_v63  ;;  %887 = vperm.xlu0 %2148, %v2626_v52   ;;  %v863_v57 = vpop.permute.xlu0 %862  ;;  %v928_v63 = vmul.f32 1.442695, %v901_v24 }
 0x1f6   : > { %v900_v23 = vsub.f32 %v2367_v29, %v863_v57  ;;  %v939_v29 = vsel %vm679_vm1, %v2642_v16, 0.0  ;;  %v943_v57 = vsel %vm679_vm1, %v2169_v62, 0.0  ;;  %v946_v62 = vsel %vm679_vm1, %v2679_v31, 0.0 }
 0x1f8   : > { %v926_v12 = vmul.f32 1.442695, %v900_v23  ;;  %v1085_v23 = vpop.permute.xlu1 %1084 }
 0x1fa   : > { %2174 = vpow2.f32 %v926_v12 }
 0x1fb   : > { %2176 = vpow2.f32 %v930_v43 }
 0x1fc   : > { %2178 = vpow2.f32 %v928_v63 }
 0x1fd   : > { %842 = vperm.xlu0 %2148, %v2571_v54  }
 0x200   : > { %v2691_v41 = vpop.eup %2174  ;;  %v848_v26 = vpop.permute.xlu1 %847 }
 0x201   : > { %v948_v46 = vsel %vm679_vm1, %v2691_v41, 0.0  ;;  %v2701_v37 = vpop.eup %2176 }
 0x202   : > { %1006 = vadd.xlane.f32.xlu2 %v948_v46  ;;  %v950_v22 = vsel %vm679_vm1, %v2701_v37, 0.0  ;;  %v2712_v16 = vpop.eup %2178 }
 0x203   : > { %v949_v12 = vsel %vm679_vm1, %v2712_v16, 0.0 }
 0x207   : > { %990 = vadd.xlane.f32.xlu1 %v940_v53  ;;  %v947_v53 = vsel %vm679_vm1, %v2681_v32, 0.0 }
 0x20a   : > { %988 = vadd.xlane.f32.xlu2 %v939_v29  ;;  %v1051_v29 = vld [vmem:[#allocation4] sm:$0xff] }
 0x20b   : > { %v1147_v13 = vmul.f32 %v2640_v5, %v1051_v29 }
 0x20f   : > { %1010 = vadd.xlane.f32.xlu1 %v950_v22 }
 0x212   : > { %994 = vadd.xlane.f32.xlu2 %v942_v28 }
 0x21a   : > { %996 = vadd.xlane.f32.xlu2 %v943_v57  ;;  %v768_v57 = vsub.f32 %v2568_v50, %v2571_v54 }
 0x227   : > { %1008 = vadd.xlane.f32.xlu0 %v949_v12 }
 0x22f   : > { %992 = vadd.xlane.f32.xlu0 %v941_v40 }
 0x237   : > { %v987_v43 = vpop.xlane.xlu1 %986  ;;  %1002 = vadd.xlane.f32.xlu0 %v946_v62 }
 0x238   : > { %v1018_v46 = vadd.f32 %v987_v43, %v970_v30  ;;  %v790_v43 = vmul.f32 1.442695, %v768_v57 }
 0x23a   : > { %1035 = vst.msk [vmem:[#allocation3] sm:$0xff] %vm398_vm2, %v1018_v46 }
 0x23f   : > { %1004 = vadd.xlane.f32.xlu0 %v947_v53 }
 0x241   : > { %v1335_v35 = vld [vmem:[#allocation3] sm:$0xff] }
 0x242   : > { %2180 = vrcp.f32 %v1335_v35  ;;  %v1362_v40 = vand.u32 2147483648, %v1335_v35  ;;  %v1360_v30 = vand.u32 2147483647, %v1335_v35  ;;  %vm1356_vm5 = vweird.f32 %v1335_v35 }
 0x243   : > { %2182 = vpow2.f32 %v790_v43 }
 0x244   : > { %v1363_v46 = vor.u32 1.1754944e-38, %v1362_v40  ;;  %vm1361_vm7 = vcmp.eq.f32.partialorder %v1360_v30, 8.507059e+37 }
 0x248   : > { %v2181_v22 = vpop.eup %2180 }
 0x249   : > { %v1352_v28 = vmul.f32 %v2181_v22, %v1335_v35  ;;  %vm1357_vm4 = vweird.f32 %v2181_v22  ;;  %v2733_v50 = vpop.eup %2182 }
 0x24a   : > { %v1228_v24 = vpop.f32.mrf.mxu1  ;;  %vm1358_vm6 = vmor %vm1356_vm5, %vm1357_vm4 }
 0x24b   : > { %v1353_v63 = vsub.f32 1.0, %v1352_v28  ;;  %v1268_v12 = vadd.f32 %v1228_v24, %v1147_v13  ;;  %v1054_v24 = vld [vmem:[#allocation4 + $0x18] sm:$0xff] }
 0x24c   : > { %v1150_v40 = vmul.f32 %v1085_v23, %v1054_v24 }
 0x24d   : > { %v1354_v33 = vmul.f32 %v2181_v22, %v1353_v63  ;;  %1284 = vst.msk [vmem:[#allocation4] sm:$0xff] %vm431_vm0, %v1268_v12 }
 0x24f   : > { %v1355_v62 = vadd.f32 %v2181_v22, %v1354_v33  ;;  %v1090_v3 = vpop.permute.xlu1 %1089 }
 0x251   : > { %v1359_v53 = vsel %vm1358_vm6, %v2181_v22, %v1355_v62  ;;  %v798_v22 = vmul.f32 1.442695, %v772_v7  ;;  %v897_v62 = vsub.f32 %v2428_v49, %v848_v26 }
 0x252   : > { %v1364_v5 = vsel %vm1361_vm7, %v1363_v46, %v1359_v53  ;;  %v2735_v54 = vpop.f32.mrf.mxu1 }
 0x253   : > { %1577 = vperm.xlu0 %2148, %v1364_v5   ;;  %2184 = vpow2.f32 %v798_v22  ;;  %v920_v7 = vmul.f32 1.442695, %v897_v62 }
 0x257   : > { %v2731_v29 = vpop.permute.xlu0 %877 }
 0x259   : > { %v2753_v46 = vpop.eup %2184 }
 0x25b   : > { %1099 = vperm.xlu0 %2148, %v2733_v50  }
 0x25f   : > { %v883_v28 = vpop.permute.xlu0 %882 }
 0x260   : > { %v904_v35 = vsub.f32 %v2435_v51, %v883_v28  ;;  %v782_v51 = vmul.f32 1.442695, %v764_v20  ;;  %v802_v28 = vmul.f32 1.442695, %v3034_v8 }
 0x262   : > { %v2738_v13 = vpop.f32.mrf.mxu1  ;;  %v934_v63 = vmul.f32 1.442695, %v904_v35 }
 0x264   : > { %2186 = vpow2.f32 %v934_v63  ;;  %v956_v63 = vld [vmem:[#allocation3 + $0x10] sm:$0xff] }
 0x267   : > { %v888_v57 = vpop.permute.xlu0 %887 }
 0x268   : > { %v905_v12 = vsub.f32 %v2445_v55, %v888_v57  ;;  %v1055_v55 = vld [vmem:[#allocation4 + $0x20] sm:$0xff] }
 0x269   : > { %v1151_v14 = vmul.f32 %v1090_v3, %v1055_v55 }
 0x26a   : > { %v936_v33 = vmul.f32 1.442695, %v905_v12  ;;  %v1235_v30 = vpop.f32.mrf.mxu1  ;;  %v2756_v26 = vpop.eup %2186  ;;  %v955_v12 = vld [vmem:[#allocation3 + $0x8] sm:$0xff] }
 0x26b   : > { %v1271_v43 = vadd.f32 %v1235_v30, %v1150_v40 }
 0x26c   : > { %2188 = vpow2.f32 %v936_v33  ;;  %v903_v33 = vsub.f32 %v2564_v48, %v2731_v29  ;;  %v966_v48 = vld [vmem:[#allocation3 + $0x60] sm:$0xff]  ;;  %v3035_v29 = vsub.f32 %v2549_v38, %v2552_v42 }
 0x26d   : > { %1287 = vst.msk [vmem:[#allocation4 + $0x18] sm:$0xff] %vm431_vm0, %v1271_v43  ;;  %2190 = vpow2.f32 %v782_v51 }
 0x26e   : > { %2192 = vpow2.f32 %v780_v0 }
 0x26f   : > { %v843_v23 = vpop.permute.xlu0 %842  ;;  %2194 = vpow2.f32 %v920_v7  ;;  %v932_v7 = vmul.f32 1.442695, %v903_v33 }
 0x270   : > { %v896_v49 = vsub.f32 %v2415_v47, %v843_v23  ;;  %v980_v47 = vmul.f32 %v2753_v46, %v964_v18  ;;  %v958_v18 = vld [vmem:[#allocation3 + $0x20] sm:$0xff] }
 0x272   : > { %v2758_v20 = vpop.eup %2188  ;;  %v918_v53 = vmul.f32 1.442695, %v896_v49  ;;  %v1238_v5 = vpop.f32.mrf.mxu1  ;;  %v788_v49 = vmul.f32 1.442695, %v3035_v29 }
 0x273   : > { %v1272_v1 = vadd.f32 %v1238_v5, %v1151_v14  ;;  %v2066_v6 = vpack.c.bf16 %v2758_v20, %v2756_v26  ;;  %v2769_v22 = vpop.eup %2190 }
 0x274   : > { %2196 = vpow2.f32 %v918_v53  ;;  %v2771_v57 = vpop.eup %2192  ;;  %v972_v19 = vmul.f32 %v2769_v22, %v956_v63 }
 0x275   : > { %1288 = vst.msk [vmem:[#allocation4 + $0x20] sm:$0xff] %vm431_vm0, %v1272_v1  ;;  %v1007_v35 = vpop.xlane.xlu2 %1006  ;;  %2067 = vmatmul.msk.bf16.vlgmr.msrb.gmra.mxu3 %vm2647_vm3, %v2066_v6  ;;  %2198 = vpow2.f32 %v802_v28  ;;  %v2195_v15 = vpop.eup %2194  ;;  %v971_v0 = vmul.f32 %v2771_v57, %v955_v12  ;;  %v974_v6 = vmul.f32 %v2659_v58, %v958_v18 }
 0x276   : > { %v1028_v24 = vadd.f32 %v1007_v35, %v980_v47  ;;  %2200 = vpow2.f32 %v932_v7  ;;  %v945_v1 = vsel %vm679_vm1, %v2195_v15, 0.0 }
 0x277   : > { %2202 = vpow2.f32 %v788_v49 }
 0x278   : > { %1045 = vst.msk [vmem:[#allocation3 + $0x50] sm:$0xff] %vm398_vm2, %v1028_v24  ;;  %v959_v24 = vld [vmem:[#allocation3 + $0x28] sm:$0xff] }
 0x27a   : > { %v2197_v40 = vpop.eup %2196  ;;  %v991_v30 = vpop.xlane.xlu1 %990 }
 0x27b   : > { %v1020_v62 = vadd.f32 %v991_v30, %v972_v19  ;;  %v944_v43 = vsel %vm679_vm1, %v2197_v40, 0.0  ;;  %v2054_v51 = vpack.c.bf16 %v2195_v15, %v2197_v40  ;;  %v2783_v3 = vpop.eup %2198  ;;  %v3036_v15 = vsub.f32 %v2505_v9, %v2508_v11 }
 0x27c   : > { %998 = vadd.xlane.f32.xlu2 %v944_v43  ;;  %v982_v14 = vmul.f32 %v2783_v3, %v966_v48  ;;  %v2794_v47 = vpop.eup %2200 }
 0x27d   : > { %1037 = vst.msk [vmem:[#allocation3 + $0x10] sm:$0xff] %vm398_vm2, %v1020_v62  ;;  %v989_v55 = vpop.xlane.xlu2 %988  ;;  %2055 = vmatmul.msk.bf16.gmra.mxu1 %vm2647_vm3, %v2054_v51  ;;  %v2797_v35 = vpop.eup %2202  ;;  %v951_v58 = vsel %vm679_vm1, %v2794_v47, 0.0  ;;  %v800_v19 = vmul.f32 1.442695, %v3036_v15 }
 0x27e   : > { %v1019_v23 = vadd.f32 %v989_v55, %v971_v0  ;;  %v975_v12 = vmul.f32 %v2797_v35, %v959_v24 }
 0x280   : > { %1036 = vst.msk [vmem:[#allocation3 + $0x8] sm:$0xff] %vm398_vm2, %v1019_v23 }
 0x282   : > { %v1011_v53 = vpop.xlane.xlu1 %1010 }
 0x283   : > { %v1030_v5 = vadd.f32 %v1011_v53, %v982_v14 }
 0x284   : > { %1000 = vadd.xlane.f32.xlu2 %v945_v1  ;;  %v1337_v8 = vld [vmem:[#allocation3 + $0x10] sm:$0xff] }
 0x285   : > { %1047 = vst.msk [vmem:[#allocation3 + $0x60] sm:$0xff] %vm398_vm2, %v1030_v5  ;;  %v995_v38 = vpop.xlane.xlu2 %994  ;;  %2204 = vrcp.f32 %v1337_v8  ;;  %v1390_v5 = vand.u32 2147483648, %v1337_v8  ;;  %vm1384_vm13 = vweird.f32 %v1337_v8 }
 0x286   : > { %v1022_v42 = vadd.f32 %v995_v38, %v974_v6  ;;  %v2060_v6 = vpack.c.bf16 %v2712_v16, %v2691_v41  ;;  %v1388_v38 = vand.u32 2147483647, %v1337_v8 }
 0x287   : > { %v1336_v28 = vld [vmem:[#allocation3 + $0x8] sm:$0xff] }
 0x288   : > { %1039 = vst.msk [vmem:[#allocation3 + $0x20] sm:$0xff] %vm398_vm2, %v1022_v42  ;;  %2206 = vrcp.f32 %v1336_v28  ;;  %v1376_v11 = vand.u32 2147483648, %v1336_v28  ;;  %v1374_v55 = vand.u32 2147483647, %v1336_v28  ;;  %vm1370_vm9 = vweird.f32 %v1336_v28 }
 0x289   : > { %2208 = vpow2.f32 %v800_v19  ;;  %v3037_v42 = vsub.f32 %v2585_v60, %v2590_v2  ;;  %v1391_v19 = vor.u32 1.1754944e-38, %v1390_v5  ;;  %vm1389_vm15 = vcmp.eq.f32.partialorder %v1388_v38, 8.507059e+37 }
 0x28a   : > { %v1377_v32 = vor.u32 1.1754944e-38, %v1376_v11  ;;  %vm1375_vm11 = vcmp.eq.f32.partialorder %v1374_v55, 8.507059e+37 }
 0x28b   : > { %v2205_v63 = vpop.eup %2204 }
 0x28c   : > { %1012 = vadd.xlane.f32.xlu2 %v951_v58  ;;  %v1380_v33 = vmul.f32 %v2205_v63, %v1337_v8  ;;  %vm1385_vm12 = vweird.f32 %v2205_v63 }
 0x28d   : > { %v997_v40 = vpop.xlane.xlu2 %996  ;;  %2058 = vmatmul.msk.bf16.gmra.mxu1 %vm2647_vm3, %v2057_v36  ;;  %v965_v36 = vld [vmem:[#allocation3 + $0x58] sm:$0xff]  ;;  %vm1386_vm14 = vmor %vm1384_vm13, %vm1385_vm12 }
 0x28e   : > { %v2207_v30 = vpop.eup %2206  ;;  %v1023_v62 = vadd.f32 %v997_v40, %v975_v12  ;;  %v1381_v9 = vsub.f32 1.0, %v1380_v33  ;;  %v957_v12 = vld [vmem:[#allocation3 + $0x18] sm:$0xff] }
 0x28f   : > { %v1366_v43 = vmul.f32 %v2207_v30, %v1336_v28  ;;  %vm1371_vm8 = vweird.f32 %v2207_v30  ;;  %v2812_v31 = vpop.eup %2208  ;;  %v794_v28 = vmul.f32 1.442695, %v3037_v42  ;;  %v2820_v24 = vld [vmem:[#allocation3 + $0x20] sm:$0xff]  ;;  %v973_v60 = vmul.f32 %v2554_v44, %v957_v12 }
 0x290   : > { %1040 = vst.msk [vmem:[#allocation3 + $0x28] sm:$0xff] %vm398_vm2, %v1023_v62  ;;  %v1382_v23 = vmul.f32 %v2205_v63, %v1381_v9  ;;  %vm1372_vm10 = vmor %vm1370_vm9, %vm1371_vm8  ;;  %v981_v14 = vmul.f32 %v2812_v31, %v965_v36  ;;  %v1418_v27 = vand.u32 2147483648, %v2820_v24 }
 0x291   : > { %v1367_v51 = vsub.f32 1.0, %v1366_v43 }
 0x292   : > { %v1383_v18 = vadd.f32 %v2205_v63, %v1382_v23 }
 0x293   : > { %v1368_v0 = vmul.f32 %v2207_v30, %v1367_v51 }
 0x294   : > { %v1387_v58 = vsel %vm1386_vm14, %v2205_v63, %v1383_v18  ;;  %v3038_v63 = vsub.f32 %v2603_v10, %v2612_v17 }
 0x295   : > { %v1369_v7 = vadd.f32 %v2207_v30, %v1368_v0  ;;  %v1392_v16 = vsel %vm1389_vm15, %v1391_v19, %v1387_v58  ;;  %v962_v0 = vld [vmem:[#allocation3 + $0x40] sm:$0xff]  ;;  %v1419_v19 = vor.u32 1.1754944e-38, %v1418_v27 }
 0x296   : > { %v796_v43 = vmul.f32 1.442695, %v3038_v63 }
 0x297   : > { %v1373_v48 = vsel %vm1372_vm10, %v2207_v30, %v1369_v7  ;;  %v1340_v29 = vld [vmem:[#allocation3 + $0x28] sm:$0xff]  ;;  %v3039_v7 = vsub.f32 %v2575_v56, %v2578_v59 }
 0x298   : > { %v1378_v49 = vsel %vm1375_vm11, %v1377_v32, %v1373_v48  ;;  %2210 = vrcp.f32 %v1340_v29  ;;  %v1432_v40 = vand.u32 2147483648, %v1340_v29  ;;  %v1430_v62 = vand.u32 2147483647, %v1340_v29  ;;  %v963_v59 = vld [vmem:[#allocation3 + $0x48] sm:$0xff] }
 0x299   : > { %1582 = vperm.xlu1 %2149, %v1378_v49   ;;  %2212 = vrcp.f32 %v2820_v24  ;;  %vm1426_vm5 = vweird.f32 %v1340_v29  ;;  %v792_v23 = vmul.f32 1.442695, %v3039_v7  ;;  %v2063_v48 = vpack.c.bf16 %v2794_v47, %v2701_v37 }
 0x29a   : > { %v1009_v53 = vpop.xlane.xlu0 %1008  ;;  %2214 = vpow2.f32 %v794_v28  ;;  %v1433_v44 = vor.u32 1.1754944e-38, %v1432_v40  ;;  %vm1431_vm7 = vcmp.eq.f32.partialorder %v1430_v62, 8.507059e+37 }
 0x29b   : > { %v1029_v1 = vadd.f32 %v1009_v53, %v981_v14  ;;  %2216 = vpow2.f32 %v796_v43 }
 0x29c   : > { %2218 = vpow2.f32 %v792_v23 }
 0x29d   : > { %1046 = vst.msk [vmem:[#allocation3 + $0x58] sm:$0xff] %vm398_vm2, %v1029_v1  ;;  %2061 = vmatmul.msk.bf16.gmra.mxu1 %vm2647_vm3, %v2060_v6  ;;  %v1416_v6 = vand.u32 2147483647, %v2820_v24 }
 0x29e   : > { %v2211_v15 = vpop.eup %2210 }
 0x29f   : > { %v1422_v41 = vmul.f32 %v2211_v15, %v1340_v29  ;;  %vm1427_vm4 = vweird.f32 %v2211_v15  ;;  %v2213_v51 = vpop.eup %2212  ;;  %vm1417_vm11 = vcmp.eq.f32.partialorder %v1416_v6, 8.507059e+37 }
 0x2a0   : > { %v2215_v11 = vpop.eup %2214  ;;  %vm1428_vm6 = vmor %vm1426_vm5, %vm1427_vm4  ;;  %v1408_v17 = vmul.f32 %v2213_v51, %v2820_v24  ;;  %vm1413_vm8 = vweird.f32 %v2213_v51 }
 0x2a1   : > { %1587 = vperm.xlu1 %2149, %v1392_v16   ;;  %v1423_v2 = vsub.f32 1.0, %v1422_v41  ;;  %v2217_v56 = vpop.eup %2216 }
 0x2a2   : > { %v993_v8 = vpop.xlane.xlu0 %992  ;;  %v1409_v29 = vsub.f32 1.0, %v1408_v17  ;;  %v979_v18 = vmul.f32 %v2217_v56, %v963_v59  ;;  %v2842_v53 = vpop.eup %2218 }
 0x2a3   : > { %v1021_v33 = vadd.f32 %v993_v8, %v973_v60  ;;  %v1424_v30 = vmul.f32 %v2211_v15, %v1423_v2  ;;  %v952_v8 = vsel %vm679_vm1, %v2756_v26, 0.0 }
 0x2a4   : > { %1074 = vperm.xlu2 %2150, %v2771_v57   ;;  %v978_v57 = vmul.f32 %v2215_v11, %v962_v0  ;;  %v1410_v14 = vmul.f32 %v2213_v51, %v1409_v29  ;;  %v2859_v43 = vld [vmem:[#allocation3 + $0x58] sm:$0xff]  ;;  %v960_v0 = vld [vmem:[#allocation3 + $0x30] sm:$0xff]  ;;  %v2882_v29 = vpop.f32.mrf.mxu1 }
 0x2a5   : > { %1038 = vst.msk [vmem:[#allocation3 + $0x18] sm:$0xff] %vm398_vm2, %v1021_v33  ;;  %v1425_v9 = vadd.f32 %v2211_v15, %v1424_v30 }
 0x2a7   : > { %v1429_v55 = vsel %vm1428_vm6, %v2211_v15, %v1425_v9 }
 0x2a8   : > { %v1434_v10 = vsel %vm1431_vm7, %v1433_v44, %v1429_v55  ;;  %vm1708_vm7 = vcmask 1043456  }
 0x2a9   : > { %1602 = vperm.xlu0 %2148, %v1434_v10   ;;  %v2871_v10 = vld [vmem:[#allocation3 + $0x60] sm:$0xff] }
 0x2aa   : > { %v1003_v32 = vpop.xlane.xlu0 %1002 }
 0x2ab   : > { %v1026_v36 = vadd.f32 %v1003_v32, %v978_v57  ;;  %v976_v32 = vmul.f32 %v2733_v50, %v960_v0  ;;  %v806_v50 = vmul.f32 1.442695, %v776_v21 }
 0x2ac   : > { %1079 = vperm.xlu2 %2150, %v2769_v22   ;;  %v1338_v49 = vld [vmem:[#allocation3 + $0x18] sm:$0xff]  ;;  %v1411_v22 = vadd.f32 %v2213_v51, %v1410_v14 }
 0x2ad   : > { %1043 = vst.msk [vmem:[#allocation3 + $0x40] sm:$0xff] %vm398_vm2, %v1026_v36  ;;  %2064 = vmatmul.msk.bf16.gmra.mxu1 %vm2647_vm3, %v2063_v48  ;;  %2220 = vrcp.f32 %v1338_v49  ;;  %vm1412_vm3 = vweird.f32 %v2820_v24  ;;  %v1404_v42 = vand.u32 2147483648, %v1338_v49  ;;  %v1402_v15 = vand.u32 2147483647, %v1338_v49  ;;  %v1345_v24 = vld [vmem:[#allocation3 + $0x50] sm:$0xff] }
 0x2ae   : > { %vm1414_vm9 = vmor %vm1412_vm3, %vm1413_vm8  ;;  %vm1398_vm12 = vweird.f32 %v1338_v49  ;;  %2222 = vrcp.f32 %v1345_v24  ;;  %v1502_v9 = vand.u32 2147483648, %v1345_v24  ;;  %vm1496_vm4 = vweird.f32 %v1345_v24 }
 0x2af   : > { %v1415_v28 = vsel %vm1414_vm9, %v2213_v51, %v1411_v22  ;;  %v1405_v16 = vor.u32 1.1754944e-38, %v1404_v42  ;;  %vm1403_vm14 = vcmp.eq.f32.partialorder %v1402_v15, 8.507059e+37  ;;  %v1710_v22 = vsel %vm1708_vm7, %v1679_v4, 0 }
 0x2b0   : > { %v1420_v41 = vsel %vm1417_vm11, %v1419_v19, %v1415_v28  ;;  %v1503_v7 = vor.u32 1.1754944e-38, %v1502_v9  ;;  %1719 = vmatpush.bf16.msra.mxu2 %v1710_v22  ;;  %vm1510_vm11 = vweird.f32 %v2859_v43  ;;  %v1053_v22 = vld [vmem:[#allocation4 + $0x10] sm:$0xff] }
 0x2b2   : > { %v1005_v5 = vpop.xlane.xlu0 %1004 }
 0x2b3   : > { %v2221_v1 = vpop.eup %2220  ;;  %v1027_v37 = vadd.f32 %v1005_v5, %v979_v18  ;;  %v1057_v18 = vld [vmem:[#allocation4 + $0x30] sm:$0xff] }
 0x2b4   : > { %1104 = vperm.xlu2 %2150, %v2842_v53   ;;  %v1394_v47 = vmul.f32 %v2221_v1, %v1338_v49  ;;  %vm1399_vm10 = vweird.f32 %v2221_v1  ;;  %v2223_v40 = vpop.eup %2222  ;;  %v2853_v30 = vld [vmem:[#allocation3 + $0x40] sm:$0xff]  ;;  %v961_v49 = vld [vmem:[#allocation3 + $0x38] sm:$0xff] }
 0x2b5   : > { %1044 = vst.msk [vmem:[#allocation3 + $0x48] sm:$0xff] %vm398_vm2, %v1027_v37  ;;  %vm1400_vm13 = vmor %vm1398_vm12, %vm1399_vm10  ;;  %v1492_v33 = vmul.f32 %v2223_v40, %v1345_v24  ;;  %2224 = vrcp.f32 %v2853_v30  ;;  %vm1497_vm15 = vweird.f32 %v2223_v40  ;;  %v1474_v37 = vand.u32 2147483648, %v2853_v30 }
 0x2b6   : > { %v1395_v38 = vsub.f32 1.0, %v1394_v47  ;;  %2226 = vrcp.f32 %v2859_v43  ;;  %vm1498_vm5 = vmor %vm1496_vm4, %vm1497_vm15  ;;  %vm1468_vm8 = vweird.f32 %v2853_v30  ;;  %v1472_v27 = vand.u32 2147483647, %v2853_v30 }
 0x2b7   : > { %v1493_v62 = vsub.f32 1.0, %v1492_v33  ;;  %2228 = vpow2.f32 %v804_v25  ;;  %v1475_v19 = vor.u32 1.1754944e-38, %v1474_v37  ;;  %vm1524_vm4 = vweird.f32 %v2871_v10 }
 0x2b8   : > { %v1396_v58 = vmul.f32 %v2221_v1, %v1395_v38  ;;  %2230 = vrcp.f32 %v2871_v10  ;;  %vm1473_vm9 = vcmp.eq.f32.partialorder %v1472_v27, 8.507059e+37 }
 0x2b9   : > { %v1494_v63 = vmul.f32 %v2223_v40, %v1493_v62  ;;  %2232 = vpow2.f32 %v806_v50 }
 0x2ba   : > { %v1397_v12 = vadd.f32 %v2221_v1, %v1396_v58 }
 0x2bb   : > { %v2861_v51 = vpop.eup %2224  ;;  %v1495_v26 = vadd.f32 %v2223_v40, %v1494_v63 }
 0x2bc   : > { %1597 = vperm.xlu2 %2150, %v1420_v41   ;;  %v1401_v60 = vsel %vm1400_vm13, %v2221_v1, %v1397_v12  ;;  %v1464_v44 = vmul.f32 %v2861_v51, %v2853_v30  ;;  %v2873_v17 = vpop.eup %2226  ;;  %vm1469_vm6 = vweird.f32 %v2861_v51  ;;  %v977_v1 = vmul.f32 %v2842_v53, %v961_v49  ;;  %v967_v41 = vld [vmem:[#allocation3 + $0x68] sm:$0xff] }
 0x2bd   : > { %v1406_v2 = vsel %vm1403_vm14, %v1405_v16, %v1401_v60  ;;  %v1506_v48 = vmul.f32 %v2873_v17, %v2859_v43  ;;  %vm1470_vm3 = vmor %vm1468_vm8, %vm1469_vm6  ;;  %vm1511_vm10 = vweird.f32 %v2873_v17  ;;  %v1514_v30 = vand.u32 2147483647, %v2859_v43  ;;  %v2915_v25 = vld [vmem:[#allocation3 + $0x48] sm:$0xff] }
 0x2be   : > { %1592 = vperm.xlu1 %2149, %v1406_v2   ;;  %v1465_v23 = vsub.f32 1.0, %v1464_v44  ;;  %vm1512_vm12 = vmor %vm1510_vm11, %vm1511_vm10 }
 0x2bf   : > { %v1507_v61 = vsub.f32 1.0, %v1506_v48  ;;  %vm1515_vm13 = vcmp.eq.f32.partialorder %v1514_v30, 8.507059e+37 }
 0x2c0   : > { %v1466_v45 = vmul.f32 %v2861_v51, %v1465_v23 }
 0x2c1   : > { %v1508_v53 = vmul.f32 %v2873_v17, %v1507_v61 }
 0x2c2   : > { %v1467_v59 = vadd.f32 %v2861_v51, %v1466_v45  ;;  %v1528_v45 = vand.u32 2147483647, %v2871_v10 }
 0x2c3   : > { %v1509_v60 = vadd.f32 %v2873_v17, %v1508_v53 }
 0x2c4   : > { %v1471_v42 = vsel %vm1470_vm3, %v2861_v51, %v1467_v59  ;;  %vm1529_vm8 = vcmp.eq.f32.partialorder %v1528_v45, 8.507059e+37 }
 0x2c5   : > { %v2869_v55 = vpop.permute.xlu0 %1577  ;;  %v1476_v16 = vsel %vm1473_vm9, %v1475_v19, %v1471_v42 }
 0x2c6   : > { %1094 = vperm.xlu1 %2149, %v2797_v35   ;;  %v953_v35 = vsel %vm679_vm1, %v2758_v20, 0.0  ;;  %v1499_v20 = vsel %vm1498_vm5, %v2223_v40, %v1495_v26  ;;  %v1516_v40 = vand.u32 2147483648, %v2859_v43  ;;  %v1052_v43 = vld [vmem:[#allocation4 + $0x8] sm:$0xff] }
 0x2cd   : > { %v1100_v5 = vpop.permute.xlu0 %1099 }
 0x2ce   : > { %1109 = vperm.xlu1 %2149, %v2215_v11   ;;  %v1500_v11 = vand.u32 2147483647, %v1345_v24  ;;  %v1153_v38 = vmul.f32 %v1100_v5, %v1057_v18 }
 0x2d0   : > { %vm1501_vm1 = vcmp.eq.f32.partialorder %v1500_v11, 8.507059e+37  ;;  %v1517_v11 = vor.u32 1.1754944e-38, %v1516_v40 }
 0x2d1   : > { %v1504_v57 = vsel %vm1501_vm1, %v1503_v7, %v1499_v20 }
 0x2d3   : > { %1014 = vadd.xlane.f32.xlu0 %v952_v8 }
 0x2e5   : > { %1016 = vadd.xlane.f32.xlu2 %v953_v35  ;;  %v1513_v35 = vsel %vm1512_vm12, %v2873_v17, %v1509_v60 }
 0x2e6   : > { %v1518_v20 = vsel %vm1515_vm13, %v1517_v11, %v1513_v35  ;;  %vm1482_vm13 = vweird.f32 %v2915_v25 }
 0x2e7   : > { %1114 = vperm.xlu0 %2148, %v2217_v56   ;;  %v2229_v56 = vpop.eup %2228 }
 0x2e8   : > { %v2890_v14 = vpop.eup %2230  ;;  %v983_v8 = vmul.f32 %v2229_v56, %v967_v41 }
 0x2e9   : > { %v1520_v58 = vmul.f32 %v2890_v14, %v2871_v10  ;;  %v2906_v24 = vpop.eup %2232  ;;  %vm1525_vm14 = vweird.f32 %v2890_v14 }
 0x2ea   : > { %vm2924_vm1 = vmor %vm1524_vm4, %vm1525_vm14 }
 0x2eb   : > { %v1521_v2 = vsub.f32 1.0, %v1520_v58 }
 0x2ed   : > { %v1522_v26 = vmul.f32 %v2890_v14, %v1521_v2 }
 0x2ef   : > { %1627 = vperm.xlu0 %2148, %v1504_v57   ;;  %v999_v36 = vpop.xlane.xlu2 %998  ;;  %v1523_v17 = vadd.f32 %v2890_v14, %v1522_v26  ;;  %v777_v57 = vsub.f32 %v2623_v34, %v2626_v52  ;;  %v1486_v26 = vand.u32 2147483647, %v2915_v25 }
 0x2f0   : > { %v1024_v39 = vadd.f32 %v999_v36, %v976_v32  ;;  %v1530_v32 = vand.u32 2147483648, %v2871_v10 }
 0x2f1   : > { %v1527_v52 = vsel %vm2924_vm1, %v2890_v14, %v1523_v17  ;;  %v808_v59 = vmul.f32 1.442695, %v777_v57  ;;  %v1322_v17 = vld [vmem:[#allocation4 + $0x18] sm:$0xff] }
 0x2f2   : > { %1041 = vst.msk [vmem:[#allocation3 + $0x30] sm:$0xff] %vm398_vm2, %v1024_v39  ;;  %v1531_v18 = vor.u32 1.1754944e-38, %v1530_v32 }
 0x2f7   : > { %1134 = vperm.xlu0 %2148, %v2229_v56   ;;  %v1001_v47 = vpop.xlane.xlu2 %1000 }
 0x2f8   : > { %v1025_v6 = vadd.f32 %v1001_v47, %v977_v1  ;;  %v1532_v1 = vsel %vm1529_vm8, %v1531_v18, %v1527_v52 }
 0x2f9   : > { %v1341_v28 = vld [vmem:[#allocation3 + $0x30] sm:$0xff] }
 0x2fa   : > { %1042 = vst.msk [vmem:[#allocation3 + $0x38] sm:$0xff] %vm398_vm2, %v1025_v6  ;;  %v1243_v15 = vpop.f32.mrf.mxu1  ;;  %2234 = vrcp.f32 %v1341_v28  ;;  %v1446_v0 = vand.u32 2147483648, %v1341_v28  ;;  %v1444_v23 = vand.u32 2147483647, %v1341_v28  ;;  %vm1440_vm5 = vweird.f32 %v1341_v28 }
 0x2fb   : > { %v1274_v12 = vadd.f32 %v1243_v15, %v1153_v38  ;;  %v1319_v15 = vld [vmem:[#allocation4] sm:$0xff] }
 0x2fc   : > { %v1447_v50 = vor.u32 1.1754944e-38, %v1446_v0  ;;  %vm1445_vm7 = vcmp.eq.f32.partialorder %v1444_v23, 8.507059e+37  ;;  %v1655_v60 = vmul.f32 %v2869_v55, %v1319_v15  ;;  %v1488_v55 = vand.u32 2147483648, %v2915_v25 }
 0x2fd   : > { %1290 = vst.msk [vmem:[#allocation4 + $0x30] sm:$0xff] %vm431_vm0, %v1274_v12  ;;  %1617 = vperm.xlu2 %2150, %v1476_v16  }
 0x2fe   : > { %v1489_v11 = vor.u32 1.1754944e-38, %v1488_v55 }
 0x2ff   : > { %1139 = vperm.xlu0 %2148, %v2906_v24   ;;  %v1013_v33 = vpop.xlane.xlu2 %1012 }
 0x300   : > { %v2235_v62 = vpop.eup %2234  ;;  %v1031_v63 = vadd.f32 %v1013_v33, %v983_v8  ;;  %v1058_v8 = vld [vmem:[#allocation4 + $0x38] sm:$0xff] }
 0x301   : > { %v1436_v51 = vmul.f32 %v2235_v62, %v1341_v28  ;;  %v1342_v9 = vld [vmem:[#allocation3 + $0x38] sm:$0xff]  ;;  %vm1441_vm15 = vweird.f32 %v2235_v62 }
 0x302   : > { %1048 = vst.msk [vmem:[#allocation3 + $0x68] sm:$0xff] %vm398_vm2, %v1031_v63  ;;  %2236 = vrcp.f32 %v1342_v9  ;;  %vm1442_vm6 = vmor %vm1440_vm5, %vm1441_vm15  ;;  %v1460_v37 = vand.u32 2147483648, %v1342_v9  ;;  %v1458_v27 = vand.u32 2147483647, %v1342_v9  ;;  %vm1454_vm9 = vweird.f32 %v1342_v9 }
 0x303   : > { %v1437_v44 = vsub.f32 1.0, %v1436_v51  ;;  %2238 = vrcp.f32 %v2915_v25  ;;  %vm1487_vm15 = vcmp.eq.f32.partialorder %v1486_v26, 8.507059e+37 }
 0x304   : > { %2240 = vpow2.f32 %v808_v59  ;;  %v1461_v42 = vor.u32 1.1754944e-38, %v1460_v37  ;;  %vm1459_vm11 = vcmp.eq.f32.partialorder %v1458_v27, 8.507059e+37 }
 0x305   : > { %1632 = vperm.xlu2 %2150, %v1518_v20   ;;  %v1438_v7 = vmul.f32 %v2235_v62, %v1437_v44 }
 0x307   : > { %v1075_v36 = vpop.permute.xlu2 %1074  ;;  %v1439_v21 = vadd.f32 %v2235_v62, %v1438_v7 }
 0x308   : > { %v2237_v48 = vpop.eup %2236  ;;  %v1148_v49 = vmul.f32 %v1075_v36, %v1052_v43 }
 0x309   : > { %v1443_v34 = vsel %vm1442_vm6, %v2235_v62, %v1439_v21  ;;  %v1450_v56 = vmul.f32 %v2237_v48, %v1342_v9  ;;  %v2239_v10 = vpop.eup %2238  ;;  %vm1455_vm3 = vweird.f32 %v2237_v48  ;;  %v1245_v62 = vpop.f32.mrf.mxu1  ;;  %v1348_v51 = vld [vmem:[#allocation3 + $0x68] sm:$0xff] }
 0x30a   : > { %v1269_v61 = vadd.f32 %v2735_v54, %v1148_v49  ;;  %v1448_v4 = vsel %vm1445_vm7, %v1447_v50, %v1443_v34  ;;  %v1478_v54 = vmul.f32 %v2239_v10, %v2915_v25  ;;  %vm1456_vm10 = vmor %vm1454_vm9, %vm1455_vm3  ;;  %v2936_v16 = vpop.eup %2240  ;;  %vm1483_vm12 = vweird.f32 %v2239_v10 }
 0x30b   : > { %1607 = vperm.xlu1 %2149, %v1448_v4   ;;  %v1451_v5 = vsub.f32 1.0, %v1450_v56  ;;  %v1583_v19 = vpop.permute.xlu1 %1582  ;;  %vm1484_vm14 = vmor %vm1482_vm13, %vm1483_vm12  ;;  %2242 = vrcp.f32 %v1348_v51  ;;  %v1544_v39 = vand.u32 2147483648, %v1348_v51  ;;  %vm1538_vm5 = vweird.f32 %v1348_v51 }
 0x30c   : > { %1285 = vst.msk [vmem:[#allocation4 + $0x8] sm:$0xff] %vm431_vm0, %v1269_v61  ;;  %v1479_v41 = vsub.f32 1.0, %v1478_v54  ;;  %v1542_v45 = vand.u32 2147483647, %v1348_v51  ;;  %v1059_v61 = vld [vmem:[#allocation4 + $0x40] sm:$0xff] }
 0x30d   : > { %1637 = vperm.xlu2 %2150, %v1532_v1   ;;  %v1452_v47 = vmul.f32 %v2237_v48, %v1451_v5  ;;  %v1545_v50 = vor.u32 1.1754944e-38, %v1544_v39  ;;  %v1263_v39 = vpop.f32.mrf.mxu3 }
 0x30e   : > { %v1480_v30 = vmul.f32 %v2239_v10, %v1479_v41  ;;  %vm1543_vm6 = vcmp.eq.f32.partialorder %v1542_v45, 8.507059e+37 }
 0x30f   : > { %v1080_v14 = vpop.permute.xlu2 %1079  ;;  %v1453_v6 = vadd.f32 %v2237_v48, %v1452_v47 }
 0x310   : > { %v1149_v38 = vmul.f32 %v1080_v14, %v1053_v22  ;;  %v1481_v35 = vadd.f32 %v2239_v10, %v1480_v30  ;;  %v1323_v22 = vld [vmem:[#allocation4 + $0x20] sm:$0xff] }
 0x311   : > { %v1457_v53 = vsel %vm1456_vm10, %v2237_v48, %v1453_v6  ;;  %v2243_v20 = vpop.eup %2242  ;;  %v1056_v48 = vld [vmem:[#allocation4 + $0x28] sm:$0xff]  ;;  %v1248_v34 = vpop.f32.mrf.mxu1 }
 0x312   : > { %v1270_v28 = vadd.f32 %v2738_v13, %v1149_v38  ;;  %v1462_v58 = vsel %vm1459_vm11, %v1461_v42, %v1457_v53  ;;  %v1485_v9 = vsel %vm1484_vm14, %v2239_v10, %v1481_v35  ;;  %vm1539_vm4 = vweird.f32 %v2243_v20  ;;  %v968_v10 = vld [vmem:[#allocation3 + $0x70] sm:$0xff] }
 0x313   : > { %v1320_v12 = vld [vmem:[#allocation4 + $0x8] sm:$0xff]  ;;  %1612 = vperm.xlu1 %2149, %v1462_v58   ;;  %v1490_v44 = vsel %vm1487_vm15, %v1489_v11, %v1485_v9  ;;  %v1588_v0 = vpop.permute.xlu1 %1587  ;;  %vm1540_vm1 = vmor %vm1538_vm5, %vm1539_vm4  ;;  %v984_v14 = vmul.f32 %v2906_v24, %v968_v10  ;;  %v1325_v10 = vld [vmem:[#allocation4 + $0x30] sm:$0xff] }
 0x314   : > { %v1656_v2 = vmul.f32 %v1583_v19, %v1320_v12  ;;  %1286 = vst.msk [vmem:[#allocation4 + $0x10] sm:$0xff] %vm431_vm0, %v1270_v28  ;;  %v969_v28 = vld [vmem:[#allocation3 + $0x78] sm:$0xff]  ;;  %v1060_v12 = vld [vmem:[#allocation4 + $0x48] sm:$0xff] }
 0x315   : > { %1144 = vperm.xlu2 %2150, %v2936_v16   ;;  %v985_v19 = vmul.f32 %v2936_v16, %v969_v28 }
 0x316   : > { %v1671_v40 = vpack.c.bf16 %v1656_v2, %v1655_v60 }
 0x317   : > { %v1105_v33 = vpop.permute.xlu2 %1104 }
 0x318   : > { %v1154_v13 = vmul.f32 %v1105_v33, %v1058_v8  ;;  %2068 = vmatmul.msk.bf16.vlgmr.msra.gmra.mxu2 %vm431_vm0, %v1671_v40 }
 0x319   : > { %v1250_v1 = vpop.f32.mrf.mxu1 }
 0x31a   : > { %v1275_v63 = vadd.f32 %v1245_v62, %v1154_v13 }
 0x31b   : > { %1119 = vperm.xlu1 %2149, %v2753_v46   ;;  %v1534_v46 = vmul.f32 %v2243_v20, %v1348_v51  ;;  %v1321_v7 = vld [vmem:[#allocation4 + $0x10] sm:$0xff] }
 0x31c   : > { %1291 = vst.msk [vmem:[#allocation4 + $0x38] sm:$0xff] %vm431_vm0, %v1275_v63  ;;  %v1657_v32 = vmul.f32 %v1588_v0, %v1321_v7 }
 0x31d   : > { %v1535_v43 = vsub.f32 1.0, %v1534_v46 }
 0x31f   : > { %v1536_v23 = vmul.f32 %v2243_v20, %v1535_v43  ;;  %v1598_v5 = vpop.permute.xlu2 %1597 }
 0x320   : > { %v1659_v27 = vmul.f32 %v1598_v5, %v1323_v22 }
 0x321   : > { %v1537_v21 = vadd.f32 %v2243_v20, %v1536_v23  ;;  %v2956_v42 = vpop.f32.mrf.mxu1 }
 0x323   : > { %1622 = vperm.xlu1 %2149, %v1490_v44   ;;  %v1064_v44 = vld [vmem:[#allocation4 + $0x68] sm:$0xff] }
 0x329   : > { %v2958_v15 = vpop.f32.mrf.mxu1 }
 0x32b   : > { %1124 = vperm.xlu1 %2149, %v2812_v31   ;;  %v1541_v31 = vsel %vm1540_vm1, %v2243_v20, %v1537_v21  ;;  %v1065_v21 = vld [vmem:[#allocation4 + $0x70] sm:$0xff] }
 0x32c   : > { %v1546_v56 = vsel %vm1543_vm6, %v1545_v50, %v1541_v31 }
 0x330   : > { %v1593_v57 = vpop.permute.xlu1 %1592 }
 0x331   : > { %v1658_v36 = vmul.f32 %v1593_v57, %v1322_v17  ;;  %v2963_v55 = vpop.f32.mrf.mxu1 }
 0x333   : > { %v1672_v25 = vpack.c.bf16 %v1658_v36, %v1657_v32  ;;  %1129 = vperm.xlu1 %2149, %v2783_v3   ;;  %v1603_v3 = vpop.permute.xlu0 %1602 }
 0x335   : > { %2069 = vmatmul.msk.bf16.gmra.mxu2 %vm431_vm0, %v1672_v25 }
 0x338   : > { %v1095_v49 = vpop.permute.xlu1 %1094 }
 0x339   : > { %v1152_v52 = vmul.f32 %v1095_v49, %v1056_v48  ;;  %v1260_v23 = vpop.f32.mrf.mxu1 }
 0x33b   : > { %v1273_v59 = vadd.f32 %v2882_v29, %v1152_v52  ;;  %1642 = vperm.xlu1 %2149, %v1546_v56  }
 0x33d   : > { %1289 = vst.msk [vmem:[#allocation4 + $0x28] sm:$0xff] %vm431_vm0, %v1273_v59  ;;  %v1066_v59 = vld [vmem:[#allocation4 + $0x78] sm:$0xff] }
 0x340   : > { %v1110_v4 = vpop.permute.xlu1 %1109 }
 0x341   : > { %v1155_v18 = vmul.f32 %v1110_v4, %v1059_v61  ;;  %v1265_v4 = vpop.f32.mrf.mxu3 }
 0x343   : > { %v1276_v37 = vadd.f32 %v1248_v34, %v1155_v18 }
 0x344   : > { %v1324_v47 = vld [vmem:[#allocation4 + $0x28] sm:$0xff] }
 0x345   : > { %1292 = vst.msk [vmem:[#allocation4 + $0x40] sm:$0xff] %vm431_vm0, %v1276_v37  ;;  %v1660_v6 = vmul.f32 %v1603_v3, %v1324_v47 }
 0x346   : > { %v1015_v29 = vpop.xlane.xlu0 %1014 }
 0x347   : > { %v1032_v54 = vadd.f32 %v1015_v29, %v984_v14  ;;  %v1673_v38 = vpack.c.bf16 %v1660_v6, %v1659_v27  ;;  %v1061_v14 = vld [vmem:[#allocation4 + $0x50] sm:$0xff] }
 0x349   : > { %1049 = vst.msk [vmem:[#allocation3 + $0x70] sm:$0xff] %vm398_vm2, %v1032_v54  ;;  %2070 = vmatmul.msk.bf16.gmra.mxu2 %vm431_vm0, %v1673_v38 }
 0x34c   : > { %v1327_v38 = vld [vmem:[#allocation4 + $0x40] sm:$0xff] }
 0x350   : > { %v1349_v53 = vld [vmem:[#allocation3 + $0x70] sm:$0xff] }
 0x351   : > { %2244 = vrcp.f32 %v1349_v53  ;;  %v1558_v33 = vand.u32 2147483648, %v1349_v53  ;;  %v1556_v62 = vand.u32 2147483647, %v1349_v53  ;;  %vm1552_vm8 = vweird.f32 %v1349_v53 }
 0x353   : > { %v1559_v16 = vor.u32 1.1754944e-38, %v1558_v33  ;;  %vm1557_vm9 = vcmp.eq.f32.partialorder %v1556_v62, 8.507059e+37 }
 0x357   : > { %v2245_v58 = vpop.eup %2244 }
 0x358   : > { %v1017_v24 = vpop.xlane.xlu2 %1016  ;;  %v1548_v41 = vmul.f32 %v2245_v58, %v1349_v53  ;;  %vm1553_vm7 = vweird.f32 %v2245_v58 }
 0x359   : > { %v1033_v60 = vadd.f32 %v1017_v24, %v985_v19  ;;  %v1115_v2 = vpop.permute.xlu0 %1114  ;;  %vm1554_vm3 = vmor %vm1552_vm8, %vm1553_vm7  ;;  %v2980_v24 = vld [vmem:[%s3030_s5] ss:$0 sm:$0xff] }
 0x35a   : > { %v1156_v8 = vmul.f32 %v1115_v2, %v1060_v12  ;;  %v1549_v40 = vsub.f32 1.0, %v1548_v41 }
 0x35b   : > { %1050 = vst.msk [vmem:[#allocation3 + $0x78] sm:$0xff] %vm398_vm2, %v1033_v60  ;;  %v1062_v60 = vld [vmem:[#allocation4 + $0x58] sm:$0xff] }
 0x35c   : > { %v1277_v30 = vadd.f32 %v1250_v1, %v1156_v8  ;;  %v1550_v13 = vmul.f32 %v2245_v58, %v1549_v40  ;;  %v1326_v1 = vld [vmem:[#allocation4 + $0x38] sm:$0xff] }
 0x35e   : > { %1293 = vst.msk [vmem:[#allocation4 + $0x48] sm:$0xff] %vm431_vm0, %v1277_v30  ;;  %v1551_v63 = vadd.f32 %v2245_v58, %v1550_v13  ;;  %v1063_v30 = vld [vmem:[#allocation4 + $0x60] sm:$0xff] }
 0x360   : > { %v1618_v35 = vpop.permute.xlu2 %1617  ;;  %v1555_v51 = vsel %vm1554_vm3, %v2245_v58, %v1551_v63 }
 0x361   : > { %v2965_v26 = vpop.permute.xlu0 %1627  ;;  %v1560_v9 = vsel %vm1557_vm9, %v1559_v16, %v1555_v51  ;;  %v1663_v58 = vmul.f32 %v1618_v35, %v1327_v38 }
 0x362   : > { %1647 = vperm.xlu1 %2149, %v1560_v9   ;;  %v1350_v11 = vld [vmem:[#allocation3 + $0x78] sm:$0xff] }
 0x363   : > { %2246 = vrcp.f32 %v1350_v11  ;;  %v1572_v32 = vand.u32 2147483648, %v1350_v11  ;;  %v1570_v25 = vand.u32 2147483647, %v1350_v11  ;;  %vm1566_vm10 = vweird.f32 %v1350_v11 }
 0x365   : > { %v1573_v49 = vor.u32 1.1754944e-38, %v1572_v32  ;;  %vm1571_vm12 = vcmp.eq.f32.partialorder %v1570_v25, 8.507059e+37  ;;  %v1328_v28 = vld [vmem:[#allocation4 + $0x48] sm:$0xff] }
 0x368   : > { %v2967_v20 = vpop.permute.xlu2 %1632 }
 0x369   : > { %v2247_v46 = vpop.eup %2246  ;;  %v1135_v0 = vpop.permute.xlu0 %1134 }
 0x36a   : > { %v1160_v43 = vmul.f32 %v1135_v0, %v1064_v44  ;;  %v1562_v7 = vmul.f32 %v2247_v46, %v1350_v11  ;;  %vm1567_vm2 = vweird.f32 %v2247_v46 }
 0x36b   : > { %vm1568_vm11 = vmor %vm1566_vm10, %vm1567_vm2 }
 0x36c   : > { %v1281_v17 = vadd.f32 %v1260_v23, %v1160_v43  ;;  %v1563_v57 = vsub.f32 1.0, %v1562_v7 }
 0x36e   : > { %1297 = vst.msk [vmem:[#allocation4 + $0x68] sm:$0xff] %vm431_vm0, %v1281_v17  ;;  %v1564_v36 = vmul.f32 %v2247_v46, %v1563_v57 }
 0x370   : > { %v2970_v45 = vpop.permute.xlu2 %1637  ;;  %v1565_v48 = vadd.f32 %v2247_v46, %v1564_v36 }
 0x371   : > { %v1140_v31 = vpop.permute.xlu0 %1139 }
 0x372   : > { %v1161_v50 = vmul.f32 %v1140_v31, %v1065_v21  ;;  %v1569_v34 = vsel %vm1568_vm11, %v2247_v46, %v1565_v48 }
 0x373   : > { %v1574_v52 = vsel %vm1571_vm12, %v1573_v49, %v1569_v34 }
 0x374   : > { %v1282_v56 = vadd.f32 %v1263_v39, %v1161_v50  ;;  %1652 = vperm.xlu0 %2148, %v1574_v52  }
 0x375   : > { %v1332_v7 = vld [vmem:[#allocation4 + $0x68] sm:$0xff] }
 0x376   : > { %1298 = vst.msk [vmem:[#allocation4 + $0x70] sm:$0xff] %vm431_vm0, %v1282_v56 }
 0x378   : > { %v1145_v3 = vpop.permute.xlu2 %1144 }
 0x379   : > { %v1162_v61 = vmul.f32 %v1145_v3, %v1066_v59 }
 0x37b   : > { %v1283_v18 = vadd.f32 %v1265_v4, %v1162_v61 }
 0x37d   : > { %1299 = vst.msk [vmem:[#allocation4 + $0x78] sm:$0xff] %vm431_vm0, %v1283_v18  ;;  %v1608_v5 = vpop.permute.xlu1 %1607  ;;  %v1333_v39 = vld [vmem:[#allocation4 + $0x70] sm:$0xff] }
 0x37e   : > { %v1661_v22 = vmul.f32 %v1608_v5, %v1325_v10 }
 0x385   : > { %v1613_v37 = vpop.permute.xlu1 %1612 }
 0x386   : > { %v1662_v47 = vmul.f32 %v1613_v37, %v1326_v1 }
 0x388   : > { %v1674_v27 = vpack.c.bf16 %v1662_v47, %v1661_v22 }
 0x38a   : > { %2071 = vmatmul.msk.bf16.gmra.mxu2 %vm431_vm0, %v1674_v27 }
 0x38d   : > { %v1120_v6 = vpop.permute.xlu1 %1119 }
 0x38e   : > { %v1157_v29 = vmul.f32 %v1120_v6, %v1061_v14 }
 0x390   : > { %v1278_v54 = vadd.f32 %v2956_v42, %v1157_v29 }
 0x392   : > { %1294 = vst.msk [vmem:[#allocation4 + $0x50] sm:$0xff] %vm431_vm0, %v1278_v54 }
 0x395   : > { %v1623_v53 = vpop.permute.xlu1 %1622 }
 0x396   : > { %v1664_v19 = vmul.f32 %v1623_v53, %v1328_v28  ;;  %v1761_v53 = vld [vmem:[%s355_s18] sm:$0xff] }
 0x398   : > { %v1675_v12 = vpack.c.bf16 %v1664_v19, %v1663_v58 }
 0x399   : > { %v1329_v16 = vld [vmem:[#allocation4 + $0x50] sm:$0xff] }
 0x39a   : > { %2072 = vmatmul.msk.bf16.gmra.mxu2 %vm431_vm0, %v1675_v12  ;;  %v1665_v9 = vmul.f32 %v2965_v26, %v1329_v16 }
 0x39b   : > { %v1721_v41 = vpop.f32.mrf.mxu2 }
 0x39c   : > { %v1722_v2 = vadd.f32 %v2980_v24, %v1721_v41 }
 0x39d   : > { %v1125_v42 = vpop.permute.xlu1 %1124 }
 0x39e   : > { %v1158_v8 = vmul.f32 %v1125_v42, %v1062_v60  ;;  %1762 = vxpose.xlu2.b32.start [1/16] (narrow) %v1722_v2, 8 }
 0x3a0   : > { %v1279_v40 = vadd.f32 %v2958_v15, %v1158_v8 }
 0x3a2   : > { %1295 = vst.msk [vmem:[#allocation4 + $0x58] sm:$0xff] %vm431_vm0, %v1279_v40 }
 0x3a3   : > { %v1723_v33 = vpop.f32.mrf.mxu2 }
 0x3a4   : > { %v1724_v13 = vadd.f32 %v2980_v24, %v1723_v33 }
 0x3a5   : > { %v1130_v62 = vpop.permute.xlu1 %1129 }
 0x3a6   : > { %v1159_v63 = vmul.f32 %v1130_v62, %v1063_v30  ;;  %1763 = vxpose.xlu2.b32.cont [2/16] (narrow) %v1724_v13, 8 }
 0x3a8   : > { %v1280_v35 = vadd.f32 %v2963_v55, %v1159_v63 }
 0x3a9   : > { %v1330_v51 = vld [vmem:[#allocation4 + $0x58] sm:$0xff] }
 0x3aa   : > { %1296 = vst.msk [vmem:[#allocation4 + $0x60] sm:$0xff] %vm431_vm0, %v1280_v35  ;;  %v1666_v11 = vmul.f32 %v2967_v20, %v1330_v51 }
 0x3ac   : > { %v1676_v15 = vpack.c.bf16 %v1666_v11, %v1665_v9 }
 0x3ad   : > { %v1643_v46 = vpop.permute.xlu1 %1642 }
 0x3ae   : > { %2073 = vmatmul.msk.bf16.gmra.mxu2 %vm431_vm0, %v1676_v15  ;;  %v1668_v17 = vmul.f32 %v1643_v46, %v1332_v7 }
 0x3b1   : > { %v1331_v44 = vld [vmem:[#allocation4 + $0x60] sm:$0xff] }
 0x3b2   : > { %v1667_v0 = vmul.f32 %v2970_v45, %v1331_v44  ;;  %v1334_v45 = vld [vmem:[#allocation4 + $0x78] sm:$0xff] }
 0x3b4   : > { %v1677_v55 = vpack.c.bf16 %v1668_v17, %v1667_v0 }
 0x3b8   : > { %v1726_v43 = vpop.f32.mrf.mxu2 }
 0x3b9   : > { %v1727_v23 = vadd.f32 %v2980_v24, %v1726_v43 }
 0x3bb   : > { %1764 = vxpose.xlu2.b32.cont [3/16] (narrow) %v1727_v23, 8 }
 0x3be   : > { %2074 = vmatmul.msk.bf16.gmra.mxu2 %vm431_vm0, %v1677_v55 }
 0x3c0   : > { %v1728_v57 = vpop.f32.mrf.mxu2 }
 0x3c1   : > { %v1729_v26 = vadd.f32 %v2980_v24, %v1728_v57 }
 0x3c3   : > { %1765 = vxpose.xlu2.b32.cont [4/16] (narrow) %v1729_v26, 8 }
 0x3cc   : > { %v1731_v20 = vpop.f32.mrf.mxu2 }
 0x3cd   : > { %v1732_v32 = vadd.f32 %v2980_v24, %v1731_v20 }
 0x3cf   : > { %1766 = vxpose.xlu2.b32.cont [5/16] (narrow) %v1732_v32, 8 }
 0x3d4   : > { %v1733_v36 = vpop.f32.mrf.mxu2  ;;  %v1648_v21 = vpop.permute.xlu1 %1647 }
 0x3d5   : > { %v1734_v25 = vadd.f32 %v2980_v24, %v1733_v36  ;;  %v1669_v31 = vmul.f32 %v1648_v21, %v1333_v39 }
 0x3d7   : > { %1767 = vxpose.xlu2.b32.cont [6/16] (narrow) %v1734_v25, 8 }
 0x3e6   : > { %v1653_v48 = vpop.permute.xlu0 %1652 }
 0x3e7   : > { %v1670_v49 = vmul.f32 %v1653_v48, %v1334_v45 }
 0x3e9   : > { %v1678_v50 = vpack.c.bf16 %v1670_v49, %v1669_v31 }
 0x3eb   : > { %2075 = vmatmul.msk.bf16.gmra.mxu2 %vm431_vm0, %v1678_v50 }
 0x40d   : > { %v1736_v34 = vpop.f32.mrf.mxu2 }
 0x40e   : > { %v1737_v52 = vadd.f32 %v2980_v24, %v1736_v34 }
 0x410   : > { %1768 = vxpose.xlu2.b32.cont [7/16] (narrow) %v1737_v52, 8 }
 0x415   : > { %v1738_v56 = vpop.f32.mrf.mxu2 }
 0x416   : > { %v1739_v59 = vadd.f32 %v2980_v24, %v1738_v56 }
 0x418   : > { %1769 = vxpose.xlu2.b32.cont [8/16] (narrow) %v1739_v59, 8 }
 0x41d   : > { %v1741_v3 = vpop.f32.mrf.mxu2 }
 0x41e   : > { %v1742_v61 = vadd.f32 %v2980_v24, %v1741_v3 }
 0x420   : > { %1770 = vxpose.xlu2.b32.cont [9/16] (narrow) %v1742_v61, 8 }
 0x425   : > { %v1743_v4 = vpop.f32.mrf.mxu2 }
 0x426   : > { %v1744_v18 = vadd.f32 %v2980_v24, %v1743_v4 }
 0x428   : > { %1771 = vxpose.xlu2.b32.cont [10/16] (narrow) %v1744_v18, 8 }
 0x431   : > { %v1746_v5 = vpop.f32.mrf.mxu2 }
 0x432   : > { %v1747_v10 = vadd.f32 %v2980_v24, %v1746_v5 }
 0x434   : > { %1772 = vxpose.xlu2.b32.cont [11/16] (narrow) %v1747_v10, 8 }
 0x439   : > { %v1748_v1 = vpop.f32.mrf.mxu2 }
 0x43a   : > { %v1749_v37 = vadd.f32 %v2980_v24, %v1748_v1 }
 0x43c   : > { %1773 = vxpose.xlu2.b32.cont [12/16] (narrow) %v1749_v37, 8 }
 0x441   : > { %v1751_v22 = vpop.f32.mrf.mxu2 }
 0x442   : > { %v1752_v47 = vadd.f32 %v2980_v24, %v1751_v22 }
 0x444   : > { %1774 = vxpose.xlu2.b32.cont [13/16] (narrow) %v1752_v47, 8 }
 0x449   : > { %v1753_v27 = vpop.f32.mrf.mxu2 }
 0x44a   : > { %v1754_v14 = vadd.f32 %v2980_v24, %v1753_v27 }
 0x44c   : > { %1775 = vxpose.xlu2.b32.cont [14/16] (narrow) %v1754_v14, 8 }
 0x46e   : > { %v1756_v6 = vpop.f32.mrf.mxu2 }
 0x46f   : > { %v1757_v29 = vadd.f32 %v2980_v24, %v1756_v6 }
 0x471   : > { %1776 = vxpose.xlu2.b32.cont [15/16] (narrow) %v1757_v29, 8 }
 0x476   : > { %v1758_v54 = vpop.f32.mrf.mxu2 }
 0x477   : > { %v1759_v38 = vadd.f32 %v2980_v24, %v1758_v54 }
 0x479   : > { %1777 = vxpose.xlu2.b32.end [16/16] (narrow) %v1759_v38, 8 }
 0x49a   : > { %v1778_v28 = vpop.trf.xlu2 }
 0x49b   : > { %v1794_v58 = vadd.f32 %v1778_v28, %v1761_v53 }
 0x49d   : > { %1795 = vst [vmem:[%s392_s25] sm:$0xff] %v1794_v58 }
 0x49e PF: > { %s16_s23 = sadd.s32 1, %s2270_s23   ;;  %s3042_s21 = smov %s2266_s22 }
 0x49f   : > { %p13_p5 = scmp.ge.s32.totalorder %s16_s23, 4   ;;  %s3043_s22 = smov %s3045_s24 }
 0x4a1   :  { %15 = sbr.rel (!%p13_p5) target bundleno = 2 (0x2), region = 91 }

</bundles_post_ra>
